<compile_context>
chip_gen: v6e
topology: v6e:2x2x1
jax: 0.10.0
libtpu: 0.0.40
codegen_flags: <defaults>
</compile_context>

<pallas_src>
import jax
import jax.numpy as jnp
from jax.experimental import pallas as pl
from jax.experimental.pallas import tpu as pltpu


# ------------------------------- kernel ------------------------------------ #

def pwff_kernel(x_ref, w1_ref, b1_ref, w2_ref, b2_ref, o_ref, acc_ref):
    # x_ref : [1, H, TL] (input dtype)   w1_ref: [TP, H] bf16   b1_ref: [TP, 1] f32
    # w2_ref: [H, TP]  bf16              b2_ref: [H, 1]  f32    o_ref : [1, H, TL]
    # acc_ref: [H, TL] f32 scratch accumulator (resident across the P-chunk axis)
    p = pl.program_id(2)

    @pl.when(p == 0)
    def _():
        acc_ref[...] = jnp.zeros_like(acc_ref)

    x = x_ref[0].astype(jnp.bfloat16)                                   # [H, TL]

    # fc_1 chunk: [TP, H] @ [H, TL] -> [TP, TL], f32 accumulation on the MXU
    h = jnp.dot(w1_ref[...], x, preferred_element_type=jnp.float32)
    h = jnp.maximum(h + b1_ref[...], 0.0)                               # f32 bias + ReLU
    # TODO(synk): dropout is identity in eval mode; training-mode dropout
    # (pltpu.prng_seed + pltpu.stateful_bernoulli masking) intentionally omitted.
    h = h.astype(jnp.bfloat16)                                          # downcast after f32 epilogue

    # fc_2 chunk: [H, TP] @ [TP, TL] -> [H, TL], accumulated over P chunks
    acc_ref[...] += jnp.dot(w2_ref[...], h, preferred_element_type=jnp.float32)

    @pl.when(p == pl.num_programs(2) - 1)
    def _():
        o_ref[0] = (acc_ref[...] + b2_ref[...]).astype(o_ref.dtype)


# --------------------------- tiling heuristics ------------------------------ #

def _round_up(n, m):
    return ((n + m - 1) // m) * m


def _cdiv(a, b):
    return (a + b - 1) // b


def _vmem_budget_bytes():
    """Chip-aware scoped-VMEM budget: ~75% of physical VMEM, capped at 100 MiB.
    v5e/v6e (128 MiB) -> 96 MiB;  v7x (64 MiB/TC) -> 48 MiB;  unknown -> 48 MiB."""
    cap = 64 * 1024 * 1024
    try:
        cap = pltpu.get_tpu_info().vmem_capacity_bytes
    except Exception:
        pass
    return min(int(cap * 0.75), 100 * 1024 * 1024)


def _vmem_estimate_bytes(H, tp, tl, x_bytes, out_bytes, single_chunk):
    wbuf = 1 if single_chunk else 2                 # resident weights are single-buffered
    weights = 2 * tp * H * 2 * wbuf                 # bf16 W1[tp,H] + W2[H,tp]
    biases = tp * 128 * 4 * wbuf + H * 128 * 4      # (x,1) lane-pads to (x,128) f32
    x_io = H * tl * x_bytes * 2                     # double-buffered x tile
    y_io = H * tl * out_bytes * 2                   # double-buffered out tile
    acc = H * tl * 4                                # f32 accumulator scratch
    interm = tp * tl * (4 + 2)                      # f32 h + bf16 cast temporaries
    return weights + biases + x_io + y_io + acc + interm


def _choose_tiles(B, H, P, L, x_bytes, out_bytes, budget, tl_cap):
    # P-chunk candidates: multiples of 128 that divide P (largest first), else full P.
    if P % 128 == 0:
        tp_cands = [c for c in range(P, 0, -128) if P % c == 0]
    else:
        tp_cands = [P]
    max_tl = max(128, (min(tl_cap, _round_up(L, 128)) // 128) * 128)
    for tl in range(max_tl, 0, -128):
        for tp in tp_cands:
            if _vmem_estimate_bytes(H, tp, tl, x_bytes, out_bytes, tp == P) <= budget:
                # keep >= 2 (B, L-tile) grid steps so both v7x TensorCores get work
                while B * _cdiv(L, tl) < 2 and tl > 128:
                    tl -= 128
                return tl, tp
    return 128, tp_cands[-1]


# ------------------------------- wrapper ------------------------------------ #

def positionwise_feedforward(x_ncl, w1, b1, w2, b2, *, tile_l=1024, out_dtype=None):
    """x_ncl: [B, hid_dim, L] (PyTorch NCL layout).
    w1: [pf_dim, hid_dim] (Conv1d fc_1 weight, kernel dim squeezed),  b1: [pf_dim]
    w2: [hid_dim, pf_dim] (Conv1d fc_2 weight, kernel dim squeezed),  b2: [hid_dim]
    out_dtype: set to jnp.bfloat16 if the consumer tolerates it (halves HBM writeback)."""
    B, H, L = x_ncl.shape
    P = w1.shape[0]
    out_dtype = x_ncl.dtype if out_dtype is None else jnp.dtype(out_dtype)

    budget = _vmem_budget_bytes()
    tl, tp = _choose_tiles(B, H, P, L, jnp.dtype(x_ncl.dtype).itemsize,
                           jnp.dtype(out_dtype).itemsize, budget, tile_l)
    n_p = P // tp
    resident = (n_p == 1)

    # Pad L up to a multiple of the (lane-dense) L tile; slice the result back.
    Lp = _round_up(L, tl)
    xp = x_ncl if Lp == L else jnp.pad(x_ncl, ((0, 0), (0, 0), (0, Lp - L)))

    # bf16 weights: halves VMEM footprint + HBM traffic, doubles MXU rate.
    w1_bf = w1.astype(jnp.bfloat16)
    w2_bf = w2.astype(jnp.bfloat16)
    b1_2d = b1.reshape(P, 1).astype(jnp.float32)
    b2_2d = b2.reshape(H, 1).astype(jnp.float32)

    grid = (B, Lp // tl, n_p)

    def build(use_single_buffer):
        def wspec(shape, index_map, const_index):
            if use_single_buffer and const_index:
                # Constant index_map -> default double-buffering only wastes VMEM.
                return pl.BlockSpec(shape, index_map, pipeline_mode=pl.Buffered(1))
            return pl.BlockSpec(shape, index_map)

        in_specs = [
            pl.BlockSpec((1, H, tl), lambda b, l, p: (b, 0, l)),        # x tile (resident over p)
            wspec((tp, H), lambda b, l, p: (p, 0), resident),           # W1 chunk
            wspec((tp, 1), lambda b, l, p: (p, 0), resident),           # b1 chunk
            wspec((H, tp), lambda b, l, p: (0, p), resident),           # W2 chunk
            wspec((H, 1), lambda b, l, p: (0, 0), True),                # b2 (always resident)
        ]
        return pl.pallas_call(
            pwff_kernel,
            out_shape=jax.ShapeDtypeStruct((B, H, Lp), out_dtype),
            grid_spec=pltpu.PrefetchScalarGridSpec(
                num_scalar_prefetch=0,
                grid=grid,
                in_specs=in_specs,
                out_specs=pl.BlockSpec((1, H, tl), lambda b, l, p: (b, 0, l)),
                scratch_shapes=[pltpu.VMEM((H, tl), jnp.float32)],
            ),
            compiler_params=pltpu.CompilerParams(
                # (B, L-tiles) independent -> pipelining + megacore / 2-TC sharding;
                # P-chunk axis is a reduction -> "arbitrary".
                dimension_semantics=("parallel", "parallel", "arbitrary"),
                vmem_limit_bytes=budget,
            ),
        )

    try:
        out = build(True)(xp, w1_bf, b1_2d, w2_bf, b2_2d)
    except Exception:
        # Fallback for JAX versions without pipeline_mode=pl.Buffered support.
        out = build(False)(xp, w1_bf, b1_2d, w2_bf, b2_2d)

    return out if Lp == L else out[:, :, :L]


# --------------------------- init & references ------------------------------ #

def init_params(key, hid_dim, pf_dim):
    """Deterministic init mirroring nn.Conv1d default (uniform +/- 1/sqrt(fan_in)).
    Weights stored in PyTorch's native [out_ch, in_ch] layout (kernel dim squeezed)."""
    k1, k2, k3, k4 = jax.random.split(key, 4)
    bound1 = 1.0 / jnp.sqrt(hid_dim)   # fc_1 fan_in = hid_dim * 1
    bound2 = 1.0 / jnp.sqrt(pf_dim)    # fc_2 fan_in = pf_dim * 1
    w1 = jax.random.uniform(k1, (pf_dim, hid_dim), jnp.float32, -bound1, bound1)
    b1 = jax.random.uniform(k2, (pf_dim,), jnp.float32, -bound1, bound1)
    w2 = jax.random.uniform(k3, (hid_dim, pf_dim), jnp.float32, -bound2, bound2)
    b2 = jax.random.uniform(k4, (hid_dim,), jnp.float32, -bound2, bound2)
    return w1, b1, w2, b2


def reference_f32(x_ncl, w1, b1, w2, b2):
    # Pure-JAX f32 reference of the PyTorch forward (eval mode, dropout = identity).
    h = jnp.einsum("ph,bhl->bpl", w1, x_ncl) + b1[None, :, None]
    h = jnp.maximum(h, 0.0)
    y = jnp.einsum("hp,bpl->bhl", w2, h) + b2[None, :, None]
    return y


def reference_bf16(x_ncl, w1, b1, w2, b2):
    # Reference matching the kernel's bf16-operand / f32-accumulate numerics.
    xb = x_ncl.astype(jnp.bfloat16)
    w1b = w1.astype(jnp.bfloat16)
    w2b = w2.astype(jnp.bfloat16)
    h = jnp.einsum("ph,bhl->bpl", w1b, xb,
                   preferred_element_type=jnp.float32) + b1[None, :, None]
    h = jnp.maximum(h, 0.0).astype(jnp.bfloat16)
    y = jnp.einsum("hp,bpl->bhl", w2b, h,
                   preferred_element_type=jnp.float32) + b2[None, :, None]
    return y


if __name__ == "__main__":
    key = jax.random.PRNGKey(0)
    kx, kp, kx2 = jax.random.split(key, 3)

    # Case 1: tile-aligned shapes (H, P multiples of 128, L multiple of 128).
    B, hid_dim, pf_dim, L = 2, 128, 256, 256
    x = jax.random.normal(kx, (B, hid_dim, L), jnp.float32)   # PyTorch NCL input
    w1, b1, w2, b2 = init_params(kp, hid_dim, pf_dim)

    out = positionwise_feedforward(x, w1, b1, w2, b2)
    out = jax.block_until_ready(out)
    assert out.shape == (B, hid_dim, L)
    assert jnp.allclose(out, reference_bf16(x, w1, b1, w2, b2), atol=5e-3, rtol=5e-3)
    assert jnp.allclose(out, reference_f32(x, w1, b1, w2, b2), atol=3e-2, rtol=3e-2)

    # Case 2: ragged L (exercises the pad-to-128-multiple + slice path).
    B2, L2 = 1, 200
    x2 = jax.random.normal(kx2, (B2, hid_dim, L2), jnp.float32)
    out2 = positionwise_feedforward(x2, w1, b1, w2, b2)
    out2 = jax.block_until_ready(out2)
    assert out2.shape == (B2, hid_dim, L2)
    assert jnp.allclose(out2, reference_bf16(x2, w1, b1, w2, b2), atol=5e-3, rtol=5e-3)
    assert jnp.allclose(out2, reference_f32(x2, w1, b1, w2, b2), atol=3e-2, rtol=3e-2)

    print("KERNEL_OK")
</pallas_src>

<mosaic_0001>
module attributes {stable_mosaic.version = 11 : i64} {
  func.func @pwff_kernel(%arg0: i32, %arg1: i32, %arg2: i32, %arg3: memref<1x128x256xf32, #tpu.memory_space<vmem>>, %arg4: memref<256x128xbf16, #tpu.memory_space<vmem>>, %arg5: memref<256x1xf32, #tpu.memory_space<vmem>>, %arg6: memref<128x256xbf16, #tpu.memory_space<vmem>>, %arg7: memref<128x1xf32, #tpu.memory_space<vmem>>, %arg8: memref<1x128x256xf32, #tpu.memory_space<vmem>>, %arg9: memref<128x256xf32, #tpu.memory_space<vmem>>) attributes {dimension_semantics = [#tpu.dimension_semantics<parallel>, #tpu.dimension_semantics<parallel>, #tpu.dimension_semantics<arbitrary>], iteration_bounds = array<i64: 2, 1, 1>, scalar_prefetch = 0 : i64, scratch_operands = 1 : i64, tpu.core_type = #tpu.core_type<tc>, window_params = [{transform_indices = @transform_0, window_bounds = array<i64: 1, 128, 256>}, {pipeline_mode = #tpu.pipeline_mode<synchronous>, transform_indices = @transform_1, window_bounds = array<i64: 256, 128>}, {pipeline_mode = #tpu.pipeline_mode<synchronous>, transform_indices = @transform_2, window_bounds = array<i64: 256, 1>}, {pipeline_mode = #tpu.pipeline_mode<synchronous>, transform_indices = @transform_3, window_bounds = array<i64: 128, 256>}, {pipeline_mode = #tpu.pipeline_mode<synchronous>, transform_indices = @transform_4, window_bounds = array<i64: 128, 1>}, {transform_indices = @transform_5, window_bounds = array<i64: 1, 128, 256>}]} {
    %c0_i32 = arith.constant 0 : i32
    %0 = arith.cmpi eq, %arg2, %c0_i32 : i32
    %1 = arith.extui %0 : i1 to i32
    %c0_i32_0 = arith.constant 0 : i32
    %2 = arith.cmpi ne, %1, %c0_i32_0 : i32
    scf.if %2 {
      %cst_17 = arith.constant 0.000000e+00 : f32
      %22 = vector.broadcast %cst_17 : f32 to vector<128x256xf32>
      %c0_18 = arith.constant 0 : index
      %c0_19 = arith.constant 0 : index
      %23 = vector.load %arg9[%c0_18, %c0_19] : memref<128x256xf32, #tpu.memory_space<vmem>>, vector<128x256xf32>
      tpu.vector_store %arg9[%c0_18, %c0_19], %22 {strides = array<i32>} : memref<128x256xf32, #tpu.memory_space<vmem>>, vector<128x256xf32>,
    } else {
    }
    %c0 = arith.constant 0 : index
    %c0_1 = arith.constant 0 : index
    %c0_2 = arith.constant 0 : index
    %3 = vector.load %arg3[%c0, %c0_1, %c0_2] : memref<1x128x256xf32, #tpu.memory_space<vmem>>, vector<1x128x256xf32>
    %4 = vector.shape_cast %3 : vector<1x128x256xf32> to vector<128x256xf32>
    %5 = arith.truncf %4 : vector<128x256xf32> to vector<128x256xbf16>
    %c0_3 = arith.constant 0 : index
    %c0_4 = arith.constant 0 : index
    %6 = vector.load %arg4[%c0_3, %c0_4] : memref<256x128xbf16, #tpu.memory_space<vmem>>, vector<256x128xbf16>
    %cst = arith.constant dense<0.000000e+00> : vector<256x256xf32>
    %7 = tpu.matmul %6, %5, %cst {dimension_numbers = #tpu.dot_dimension_numbers<[1], [0], [0], [1], [0, 0, 1, 1], [], []>} : vector<256x128xbf16>, vector<128x256xbf16>, vector<256x256xf32> -> vector<256x256xf32>
    %c0_5 = arith.constant 0 : index
    %c0_6 = arith.constant 0 : index
    %8 = vector.load %arg5[%c0_5, %c0_6] : memref<256x1xf32, #tpu.memory_space<vmem>>, vector<256x1xf32>
    %9 = vector.broadcast %8 : vector<256x1xf32> to vector<256x256xf32>
    %10 = arith.addf %7, %9 : vector<256x256xf32>
    %cst_7 = arith.constant 0.000000e+00 : f32
    %11 = vector.broadcast %cst_7 : f32 to vector<256x256xf32>
    %12 = arith.maximumf %10, %11 : vector<256x256xf32>
    %13 = arith.truncf %12 : vector<256x256xf32> to vector<256x256xbf16>
    %c0_8 = arith.constant 0 : index
    %c0_9 = arith.constant 0 : index
    %14 = vector.load %arg9[%c0_8, %c0_9] : memref<128x256xf32, #tpu.memory_space<vmem>>, vector<128x256xf32>
    %c0_10 = arith.constant 0 : index
    %c0_11 = arith.constant 0 : index
    %15 = vector.load %arg6[%c0_10, %c0_11] : memref<128x256xbf16, #tpu.memory_space<vmem>>, vector<128x256xbf16>
    %cst_12 = arith.constant dense<0.000000e+00> : vector<128x256xf32>
    %16 = tpu.matmul %15, %13, %cst_12 {dimension_numbers = #tpu.dot_dimension_numbers<[1], [0], [0], [1], [0, 0, 1, 1], [], []>} : vector<128x256xbf16>, vector<256x256xbf16>, vector<128x256xf32> -> vector<128x256xf32>
    %17 = arith.addf %14, %16 : vector<128x256xf32>
    %c0_13 = arith.constant 0 : index
    %c0_14 = arith.constant 0 : index
    %18 = vector.load %arg9[%c0_13, %c0_14] : memref<128x256xf32, #tpu.memory_space<vmem>>, vector<128x256xf32>
    tpu.vector_store %arg9[%c0_13, %c0_14], %17 {strides = array<i32>} : memref<128x256xf32, #tpu.memory_space<vmem>>, vector<128x256xf32>,
    %c0_i32_15 = arith.constant 0 : i32
    %19 = arith.cmpi eq, %arg2, %c0_i32_15 : i32
    %20 = arith.extui %19 : i1 to i32
    %c0_i32_16 = arith.constant 0 : i32
    %21 = arith.cmpi ne, %20, %c0_i32_16 : i32
    scf.if %21 {
      %c0_17 = arith.constant 0 : index
      %c0_18 = arith.constant 0 : index
      %22 = vector.load %arg9[%c0_17, %c0_18] : memref<128x256xf32, #tpu.memory_space<vmem>>, vector<128x256xf32>
      %c0_19 = arith.constant 0 : index
      %c0_20 = arith.constant 0 : index
      %23 = vector.load %arg7[%c0_19, %c0_20] : memref<128x1xf32, #tpu.memory_space<vmem>>, vector<128x1xf32>
      %24 = vector.broadcast %23 : vector<128x1xf32> to vector<128x256xf32>
      %25 = arith.addf %22, %24 : vector<128x256xf32>
      %c0_21 = arith.constant 0 : index
      %c0_22 = arith.constant 0 : index
      %c0_23 = arith.constant 0 : index
      %26 = vector.load %arg8[%c0_21, %c0_22, %c0_23] : memref<1x128x256xf32, #tpu.memory_space<vmem>>, vector<1x128x256xf32>
      %27 = vector.shape_cast %26 : vector<1x128x256xf32> to vector<128x256xf32>
      %28 = vector.shape_cast %25 : vector<128x256xf32> to vector<1x128x256xf32>
      tpu.vector_store %arg8[%c0_21, %c0_22, %c0_23], %28 {strides = array<i32>} : memref<1x128x256xf32, #tpu.memory_space<vmem>>, vector<1x128x256xf32>,
    } else {
    }
    return
  }
  func.func @transform_0(%arg0: i32, %arg1: i32, %arg2: i32) -> (i32, i32, i32) {
    %c0_i32 = arith.constant 0 : i32
    %c0_i32_0 = arith.constant 0 : i32
    return %arg0, %c0_i32, %arg1 : i32, i32, i32
  }
  func.func @transform_1(%arg0: i32, %arg1: i32, %arg2: i32) -> (i32, i32) {
    %c0_i32 = arith.constant 0 : i32
    %c0_i32_0 = arith.constant 0 : i32
    return %arg2, %c0_i32 : i32, i32
  }
  func.func @transform_2(%arg0: i32, %arg1: i32, %arg2: i32) -> (i32, i32) {
    %c0_i32 = arith.constant 0 : i32
    %c0_i32_0 = arith.constant 0 : i32
    return %arg2, %c0_i32 : i32, i32
  }
  func.func @transform_3(%arg0: i32, %arg1: i32, %arg2: i32) -> (i32, i32) {
    %c0_i32 = arith.constant 0 : i32
    %c0_i32_0 = arith.constant 0 : i32
    return %c0_i32, %arg2 : i32, i32
  }
  func.func @transform_4(%arg0: i32, %arg1: i32, %arg2: i32) -> (i32, i32) {
    %c0_i32 = arith.constant 0 : i32
    %c0_i32_0 = arith.constant 0 : i32
    %c0_i32_1 = arith.constant 0 : i32
    return %c0_i32, %c0_i32_0 : i32, i32
  }
  func.func @transform_5(%arg0: i32, %arg1: i32, %arg2: i32) -> (i32, i32, i32) {
    %c0_i32 = arith.constant 0 : i32
    %c0_i32_0 = arith.constant 0 : i32
    return %arg0, %c0_i32, %arg1 : i32, i32, i32
  }
}

module attributes {stable_mosaic.version = 11 : i64} {
  func.func @pwff_kernel(%arg0: i32, %arg1: i32, %arg2: i32, %arg3: memref<1x128x256xf32, #tpu.memory_space<vmem>>, %arg4: memref<256x128xbf16, #tpu.memory_space<vmem>>, %arg5: memref<256x1xf32, #tpu.memory_space<vmem>>, %arg6: memref<128x256xbf16, #tpu.memory_space<vmem>>, %arg7: memref<128x1xf32, #tpu.memory_space<vmem>>, %arg8: memref<1x128x256xf32, #tpu.memory_space<vmem>>, %arg9: memref<128x256xf32, #tpu.memory_space<vmem>>) attributes {dimension_semantics = [#tpu.dimension_semantics<parallel>, #tpu.dimension_semantics<parallel>, #tpu.dimension_semantics<arbitrary>], iteration_bounds = array<i64: 2, 1, 1>, scalar_prefetch = 0 : i64, scratch_operands = 1 : i64, tpu.core_type = #tpu.core_type<tc>, window_params = [{transform_indices = @transform_0, window_bounds = array<i64: 1, 128, 256>}, {transform_indices = @transform_1, window_bounds = array<i64: 256, 128>}, {transform_indices = @transform_2, window_bounds = array<i64: 256, 1>}, {transform_indices = @transform_3, window_bounds = array<i64: 128, 256>}, {pipeline_mode = #tpu.pipeline_mode<synchronous>, transform_indices = @transform_4, window_bounds = array<i64: 128, 1>}, {transform_indices = @transform_5, window_bounds = array<i64: 1, 128, 256>}]} {
    %c0_i32 = arith.constant 0 : i32
    %0 = arith.cmpi eq, %arg2, %c0_i32 : i32
    %1 = arith.extui %0 : i1 to i32
    %c0_i32_0 = arith.constant 0 : i32
    %2 = arith.cmpi ne, %1, %c0_i32_0 : i32
    scf.if %2 {
      %cst_17 = arith.constant 0.000000e+00 : f32
      %22 = vector.broadcast %cst_17 : f32 to vector<128x256xf32>
      %c0_18 = arith.constant 0 : index
      %c0_19 = arith.constant 0 : index
      %23 = vector.load %arg9[%c0_18, %c0_19] : memref<128x256xf32, #tpu.memory_space<vmem>>, vector<128x256xf32>
      tpu.vector_store %arg9[%c0_18, %c0_19], %22 {strides = array<i32>} : memref<128x256xf32, #tpu.memory_space<vmem>>, vector<128x256xf32>,
    } else {
    }
    %c0 = arith.constant 0 : index
    %c0_1 = arith.constant 0 : index
    %c0_2 = arith.constant 0 : index
    %3 = vector.load %arg3[%c0, %c0_1, %c0_2] : memref<1x128x256xf32, #tpu.memory_space<vmem>>, vector<1x128x256xf32>
    %4 = vector.shape_cast %3 : vector<1x128x256xf32> to vector<128x256xf32>
    %5 = arith.truncf %4 : vector<128x256xf32> to vector<128x256xbf16>
    %c0_3 = arith.constant 0 : index
    %c0_4 = arith.constant 0 : index
    %6 = vector.load %arg4[%c0_3, %c0_4] : memref<256x128xbf16, #tpu.memory_space<vmem>>, vector<256x128xbf16>
    %cst = arith.constant dense<0.000000e+00> : vector<256x256xf32>
    %7 = tpu.matmul %6, %5, %cst {dimension_numbers = #tpu.dot_dimension_numbers<[1], [0], [0], [1], [0, 0, 1, 1], [], []>} : vector<256x128xbf16>, vector<128x256xbf16>, vector<256x256xf32> -> vector<256x256xf32>
    %c0_5 = arith.constant 0 : index
    %c0_6 = arith.constant 0 : index
    %8 = vector.load %arg5[%c0_5, %c0_6] : memref<256x1xf32, #tpu.memory_space<vmem>>, vector<256x1xf32>
    %9 = vector.broadcast %8 : vector<256x1xf32> to vector<256x256xf32>
    %10 = arith.addf %7, %9 : vector<256x256xf32>
    %cst_7 = arith.constant 0.000000e+00 : f32
    %11 = vector.broadcast %cst_7 : f32 to vector<256x256xf32>
    %12 = arith.maximumf %10, %11 : vector<256x256xf32>
    %13 = arith.truncf %12 : vector<256x256xf32> to vector<256x256xbf16>
    %c0_8 = arith.constant 0 : index
    %c0_9 = arith.constant 0 : index
    %14 = vector.load %arg9[%c0_8, %c0_9] : memref<128x256xf32, #tpu.memory_space<vmem>>, vector<128x256xf32>
    %c0_10 = arith.constant 0 : index
    %c0_11 = arith.constant 0 : index
    %15 = vector.load %arg6[%c0_10, %c0_11] : memref<128x256xbf16, #tpu.memory_space<vmem>>, vector<128x256xbf16>
    %cst_12 = arith.constant dense<0.000000e+00> : vector<128x256xf32>
    %16 = tpu.matmul %15, %13, %cst_12 {dimension_numbers = #tpu.dot_dimension_numbers<[1], [0], [0], [1], [0, 0, 1, 1], [], []>} : vector<128x256xbf16>, vector<256x256xbf16>, vector<128x256xf32> -> vector<128x256xf32>
    %17 = arith.addf %14, %16 : vector<128x256xf32>
    %c0_13 = arith.constant 0 : index
    %c0_14 = arith.constant 0 : index
    %18 = vector.load %arg9[%c0_13, %c0_14] : memref<128x256xf32, #tpu.memory_space<vmem>>, vector<128x256xf32>
    tpu.vector_store %arg9[%c0_13, %c0_14], %17 {strides = array<i32>} : memref<128x256xf32, #tpu.memory_space<vmem>>, vector<128x256xf32>,
    %c0_i32_15 = arith.constant 0 : i32
    %19 = arith.cmpi eq, %arg2, %c0_i32_15 : i32
    %20 = arith.extui %19 : i1 to i32
    %c0_i32_16 = arith.constant 0 : i32
    %21 = arith.cmpi ne, %20, %c0_i32_16 : i32
    scf.if %21 {
      %c0_17 = arith.constant 0 : index
      %c0_18 = arith.constant 0 : index
      %22 = vector.load %arg9[%c0_17, %c0_18] : memref<128x256xf32, #tpu.memory_space<vmem>>, vector<128x256xf32>
      %c0_19 = arith.constant 0 : index
      %c0_20 = arith.constant 0 : index
      %23 = vector.load %arg7[%c0_19, %c0_20] : memref<128x1xf32, #tpu.memory_space<vmem>>, vector<128x1xf32>
      %24 = vector.broadcast %23 : vector<128x1xf32> to vector<128x256xf32>
      %25 = arith.addf %22, %24 : vector<128x256xf32>
      %c0_21 = arith.constant 0 : index
      %c0_22 = arith.constant 0 : index
      %c0_23 = arith.constant 0 : index
      %26 = vector.load %arg8[%c0_21, %c0_22, %c0_23] : memref<1x128x256xf32, #tpu.memory_space<vmem>>, vector<1x128x256xf32>
      %27 = vector.shape_cast %26 : vector<1x128x256xf32> to vector<128x256xf32>
      %28 = vector.shape_cast %25 : vector<128x256xf32> to vector<1x128x256xf32>
      tpu.vector_store %arg8[%c0_21, %c0_22, %c0_23], %28 {strides = array<i32>} : memref<1x128x256xf32, #tpu.memory_space<vmem>>, vector<1x128x256xf32>,
    } else {
    }
    return
  }
  func.func @transform_0(%arg0: i32, %arg1: i32, %arg2: i32) -> (i32, i32, i32) {
    %c0_i32 = arith.constant 0 : i32
    %c0_i32_0 = arith.constant 0 : i32
    return %arg0, %c0_i32, %arg1 : i32, i32, i32
  }
  func.func @transform_1(%arg0: i32, %arg1: i32, %arg2: i32) -> (i32, i32) {
    %c0_i32 = arith.constant 0 : i32
    %c0_i32_0 = arith.constant 0 : i32
    return %arg2, %c0_i32 : i32, i32
  }
  func.func @transform_2(%arg0: i32, %arg1: i32, %arg2: i32) -> (i32, i32) {
    %c0_i32 = arith.constant 0 : i32
    %c0_i32_0 = arith.constant 0 : i32
    return %arg2, %c0_i32 : i32, i32
  }
  func.func @transform_3(%arg0: i32, %arg1: i32, %arg2: i32) -> (i32, i32) {
    %c0_i32 = arith.constant 0 : i32
    %c0_i32_0 = arith.constant 0 : i32
    return %c0_i32, %arg2 : i32, i32
  }
  func.func @transform_4(%arg0: i32, %arg1: i32, %arg2: i32) -> (i32, i32) {
    %c0_i32 = arith.constant 0 : i32
    %c0_i32_0 = arith.constant 0 : i32
    %c0_i32_1 = arith.constant 0 : i32
    return %c0_i32, %c0_i32_0 : i32, i32
  }
  func.func @transform_5(%arg0: i32, %arg1: i32, %arg2: i32) -> (i32, i32, i32) {
    %c0_i32 = arith.constant 0 : i32
    %c0_i32_0 = arith.constant 0 : i32
    return %arg0, %c0_i32, %arg1 : i32, i32, i32
  }
}

</mosaic_0001>

<bundles_post_ra>
// kernel: tpu_custom_call.1
= control target key start
LH: loop header
LB: loop body
LE: loop exit
PB: predicated region body
PF: predicated region fallthrough
CT: control target
= control target key end

     0   :  { %10 = vsyncpa [#allocation4], 0  ;;  %s2645_s0 = inlined_call_operand.hbm [shape: f32[2,128,256], index: 0, kind: input, shape index: {}]   ;;  %s2646_s1 = inlined_call_operand.vmem [shape: bf16[256,128], index: 1, kind: input, shape index: {}]   ;;  %s2647_s2 = inlined_call_operand.vmem [shape: f32[256,1], index: 2, kind: input, shape index: {}]   ;;  %s2648_s3 = inlined_call_operand.vmem [shape: bf16[128,256], index: 3, kind: input, shape index: {}]   ;;  %s2649_s4 = inlined_call_operand.vmem [shape: f32[128,1], index: 4, kind: input, shape index: {}]   ;;  %s2650_s5 = inlined_call_operand.hbm [shape: f32[2,128,256], index: 5, kind: output, shape index: {}]  }
   0x1   :  { %12 = vsyncpa [#allocation4 + $0x1], 0 }
   0x2   :  { %13 = vsyncpa [#allocation5], 0 }
   0x3   :  { %15 = vsyncpa [#allocation5 + $0x1], 0  ;;  %s1989_s18 = smov 0   ;;  %s1991_s19 = smov 0  }
   0x4   :  { %s1993_s20 = smov 0   ;;  %s1995_s21 = smov 0  }
   0x5   :  { %s1997_s22 = smov 0   ;;  %s1999_s23 = smov 0  }
   0x6 LB: > { %s1681_s24 = sadd.s32 4294967295, %s1950_s23   ;;  %s1682_s25 = sadd.s32 4294967294, %s1950_s23   ;;  %s1950_s23 = sphi %s1999_s23, %s21_s23   ;;  %s1946_s22 = sphi %s1997_s22, %s2676_s22   ;;  %s1942_s21 = sphi %s1995_s21, %s2675_s21   ;;  %s1938_s20 = sphi %s1993_s20, %s2674_s20   ;;  %s1934_s19 = sphi %s1991_s19, %s2673_s19   ;;  %s1930_s18 = sphi %s1989_s18, %s2672_s18  }
   0x7   : > { %s40_s26 = sadd.s32 1, %s1946_s22  ;;  %s49_s27 = sadd.s32 1, %s1938_s20 }
   0x8   : > { %p42_p0 = scmp.ge.s32.totalorder %s40_s26, 2  ;;  %p56_p1 = scmp.ne.s32.totalorder %s1938_s20, %s1934_s19 }
   0x9   : > { %p57_p2 = scmp.eq.s32.totalorder %s1950_s23, 0  ;;  %p62_p3 = scmp.ne.s32.totalorder %s1934_s19, %s1930_s18 }
   0xa   : > { %s2678_s26 = smov (%p42_p0, %s40_s26), 0  ;;  %p63_p5 = scmp.eq.s32.totalorder %s1681_s24, 0 }
   0xb   : > { %p2030_p4 = por %p57_p2, %p56_p1  ;;  %s44_s29 = ssub.s32 %s1946_s22, %s2678_s26 }
   0xc   : > { %p187_p6 = scmp.eq.s32.totalorder %s1681_s24, 1  ;;  %p47_p7 = scmp.eq.s32.totalorder %s44_s29, 0 }
   0xd   : > { %p2036_p8 = por %p63_p5, %p62_p3  ;;  %p193_p10 = scmp.eq.s32.totalorder %s1682_s25, 1 }
   0xe   : > { %p2040_p9 = por %p187_p6, %p56_p1  ;;  %p1745_p13 = scmp.lt.s32.totalorder %s1950_s23, 2 }
   0xf   : > { %s2045_s7 = scalar_select %p47_p7, %s1938_s20, %s49_s27  }
  0x10   : > { %p2047_p11 = por %p193_p10, %p62_p3  ;;  %s243_s9 = sand.u32 1, %s1938_s20  }
  0x11   : > { %s1688_s10 = sshll.u32 %s243_s9, 8  ;;  %s1731_s11 = sshll.u32 %s1946_s22, 12 }
  0x12   : > { %s255_s14 = scalar_lea.hbm %s2645_s0, %s1731_s11  ;;  %s247_s15 = scalar_lea.vmem [#allocation3], %s1688_s10 }
  0x13   : > { %s256_s16 = sshll.u32 %s247_s15, 4  ;;  %p2060_p0 = pnand %p1745_p13, %p2030_p4  ;;  %s257_s16 = int_to_ptr.vmem [resolvable:$true] %s256_s16 }
  0x14   : > { %p1691_p1 = scmp.ge.s32.totalorder %s1950_s23, 1  ;;  %s244_s24 = scalar_lea.sflag [#allocation4], %s243_s9 }
  0x15   : > { %p1844_p2 = pneg %p2060_p0  ;;  %s1855_s25 = scalar_lea.vmem %s257_s16, 4096 }
  0x16   : > { %p1856_p3 = scmp.ne.s32.totalorder %s257_s16, %s1855_s25  ;;  %s1952_s27 = smov [#allocation3]  }
  0x17   : > { %s1860_s29 = sshll.u32 %s1952_s27, 4  ;;  %s1861_s29 = int_to_ptr.vmem [resolvable:$false] %s1860_s29 }
  0x18   : > { %p1858_p5 = pnand %p1856_p3, %p1844_p2  ;;  %s1862_s10 = scalar_lea.vmem %s1861_s29, 8192 }
  0x19   : > { %p1863_p7 = scmp.lt.s32.totalorder %s257_s16, %s1861_s29  ;;  %p1864_p10 = scmp.lt.s32.totalorder %s1862_s10, %s1855_s25 }
  0x1a   : > { %p1859_p6 = pneg %p1858_p5 }
  0x1b   : > { %p1865_p12 = por %p1864_p10, %p1863_p7 }
  0x1d   : > { %p1866_p4 = pnand %p1865_p12, %p1859_p6 }
  0x1f   : > { %1869 = shalt.err (!%p1866_p4)
}
  0x20   : > { %s1953_s28 = smov 256   ;;  %s1954_s9 = smov 16  }
  0x21   : > { %1740 = dma.hbm_to_vmem [thread:$0]  (!%p2060_p0), %s255_s14, 4096, %s257_s16, %s244_s24, %s1953_s28, %s1953_s28, %s1954_s9  }
  0x22   : > { %p264_p13 = scmp.lt.s32.totalorder %s1950_s23, 3 }
  0x24   : > { %p265_p2 = pnand %p1691_p1, %p264_p13 }
  0x26   : > { %268 = sbr.rel (%p265_p2) target bundleno = 710 (0x2c6), region = 40 }
  0x2b   : > { %s2073_s11 = sand.u32 1, %s1934_s19  }
  0x2c   : > { %s1692_s12 = sshll.u32 %s2073_s11, 8  ;;  %s271_s13 = scalar_lea.sflag [#allocation4], %s2073_s11 }
  0x2d   : > { %s2079_s15 = scalar_lea.vmem [#allocation3], %s1692_s12 }
  0x2e   : > { %1921 = dma.done.wait (%p2036_p8), %s271_s13, 4096  }
  0x2f   : > { %1923 = vsyncadd (%p2036_p8), %s271_s13, 4294963200  ;;  %v1955_v0 = vmov 0   ;;  %v402_v1 = vld [vmem:[%s2079_s15 + $0xe8] sm:$0xff]  ;;  %v404_v2 = vld [vmem:[%s2079_s15 + $0xf8] sm:$0xff]  ;;  %s2556_s25 = scalar_lea.vmem [#allocation6], %s1692_s12  ;;  %s1732_s12 = sshll.u32 %s1942_s21, 12 }
  0x30   : > { %773 = vmatprep.mubr.bf16.mxu0 %v1955_v0  ;;  %1800 = vset.pattern.permute.xlu0 %v1955_v0  ;;  %v401_v3 = vld [vmem:[%s2079_s15 + $0xe0] sm:$0xff]  ;;  %v420_v4 = vpack.c.bf16 %v404_v2, %v402_v1  ;;  %v403_v5 = vld [vmem:[%s2079_s15 + $0xf0] sm:$0xff]  ;;  %v398_v6 = vld [vmem:[%s2079_s15 + $0xc8] sm:$0xff]  ;;  %s2593_s10 = scalar_lea.hbm %s2650_s5, %s1732_s12  ;;  %s1531_s21 = scalar_lea.sflag [#allocation5], %s2073_s11 }
  0x31   : > { %1801 = vset.pattern.permute.xlu1 %v1955_v0  ;;  %v400_v7 = vld [vmem:[%s2079_s15 + $0xd8] sm:$0xff]  ;;  %v419_v8 = vpack.c.bf16 %v403_v5, %v401_v3  ;;  %v397_v10 = vld [vmem:[%s2079_s15 + $0xc0] sm:$0xff]  ;;  %v399_v11 = vld [vmem:[%s2079_s15 + $0xd0] sm:$0xff]  ;;  %s1956_s9 = smov [#allocation6]  }
  0x32   : > { %v418_v9 = vpack.c.bf16 %v400_v7, %v398_v6  ;;  %v394_v12 = vld [vmem:[%s2079_s15 + $0xa8] sm:$0xff]  ;;  %741 = vmatprep.subr.bf16.mxu0 %v420_v4  ;;  %v396_v13 = vld [vmem:[%s2079_s15 + $0xb8] sm:$0xff]  ;;  %v417_v14 = vpack.c.bf16 %v399_v11, %v397_v10  ;;  %v393_v16 = vld [vmem:[%s2079_s15 + $0xa0] sm:$0xff]  ;;  %s1874_s13 = sshll.u32 %s1956_s9, 4  ;;  %s1875_s13 = int_to_ptr.vmem [resolvable:$false] %s1874_s13 }
  0x33   : > { %742 = vmatpush1.bf16.msra.mxu0 %v419_v8  ;;  %v416_v15 = vpack.c.bf16 %v396_v13, %v394_v12  ;;  %v395_v17 = vld [vmem:[%s2079_s15 + $0xb0] sm:$0xff]  ;;  %v390_v18 = vld [vmem:[%s2079_s15 + $0x88] sm:$0xff]  ;;  %v392_v19 = vld [vmem:[%s2079_s15 + $0x98] sm:$0xff]  ;;  %s1876_s30 = scalar_lea.vmem %s1875_s13, 8192 }
  0x34   : > { %743 = vmatprep.subr.bf16.mxu0 %v418_v9  ;;  %v415_v20 = vpack.c.bf16 %v395_v17, %v393_v16  ;;  %v414_v21 = vpack.c.bf16 %v392_v19, %v390_v18  ;;  %v389_v22 = vld [vmem:[%s2079_s15 + $0x80] sm:$0xff]  ;;  %v391_v23 = vld [vmem:[%s2079_s15 + $0x90] sm:$0xff]  ;;  %v386_v24 = vld [vmem:[%s2079_s15 + $0x68] sm:$0xff] }
  0x35   : > { %v388_v25 = vld [vmem:[%s2079_s15 + $0x78] sm:$0xff]  ;;  %v385_v26 = vld [vmem:[%s2079_s15 + $0x60] sm:$0xff]  ;;  %v413_v27 = vpack.c.bf16 %v391_v23, %v389_v22  ;;  %v387_v28 = vld [vmem:[%s2079_s15 + $0x70] sm:$0xff] }
  0x36   : > { %v412_v29 = vpack.c.bf16 %v388_v25, %v386_v24  ;;  %v382_v30 = vld [vmem:[%s2079_s15 + $0x48] sm:$0xff]  ;;  %v384_v31 = vld [vmem:[%s2079_s15 + $0x58] sm:$0xff]  ;;  %v381_v32 = vld [vmem:[%s2079_s15 + $0x40] sm:$0xff]  ;;  %v411_v33 = vpack.c.bf16 %v387_v28, %v385_v26 }
  0x37   : > { %744 = vmatpush1.bf16.msra.mxu0 %v417_v14  ;;  %v383_v34 = vld [vmem:[%s2079_s15 + $0x50] sm:$0xff]  ;;  %v410_v36 = vpack.c.bf16 %v384_v31, %v382_v30  ;;  %v378_v37 = vld [vmem:[%s2079_s15 + $0x28] sm:$0xff]  ;;  %v465_v38 = vld [vmem:[%s2647_s2 + $0x60] sm:$0xff] }
  0x38   : > { %745 = vmatprep.subr.bf16.mxu0 %v416_v15  ;;  %v467_v35 = vld [vmem:[%s2647_s2 + $0x70] sm:$0xff]  ;;  %v380_v39 = vld [vmem:[%s2079_s15 + $0x38] sm:$0xff]  ;;  %547 = vperm.xlu1 %1801, %v465_v38   ;;  %v466_v41 = vld [vmem:[%s2647_s2 + $0x68] sm:$0xff]  ;;  %v409_v42 = vpack.c.bf16 %v383_v34, %v381_v32 }
  0x39   : > { %557 = vperm.xlu0 %1800, %v467_v35   ;;  %v468_v40 = vld [vmem:[%s2647_s2 + $0x78] sm:$0xff]  ;;  %v377_v43 = vld [vmem:[%s2079_s15 + $0x20] sm:$0xff]  ;;  %v408_v44 = vpack.c.bf16 %v380_v39, %v378_v37  ;;  %v379_v45 = vld [vmem:[%s2079_s15 + $0x30] sm:$0xff] }
  0x3a   : > { %v374_v46 = vld [vmem:[%s2079_s15 + $0x8] sm:$0xff]  ;;  %v376_v47 = vld [vmem:[%s2079_s15 + $0x18] sm:$0xff]  ;;  %v463_v48 = vld [vmem:[%s2647_s2 + $0x50] sm:$0xff]  ;;  %v407_v50 = vpack.c.bf16 %v379_v45, %v377_v43 }
  0x3b   : > { %746 = vmatpush1.bf16.msra.mxu0 %v415_v20  ;;  %v464_v49 = vld [vmem:[%s2647_s2 + $0x58] sm:$0xff]  ;;  %v406_v51 = vpack.c.bf16 %v376_v47, %v374_v46  ;;  %v373_v52 = vld [vmem:[%s2079_s15] sm:$0xff]  ;;  %v375_v53 = vld [vmem:[%s2079_s15 + $0x10] sm:$0xff]  ;;  %s1546_s15 = sshll.u32 %s2556_s25, 4  ;;  %s2595_s15 = int_to_ptr.vmem [resolvable:$true] %s1546_s15 }
  0x3c   : > { %747 = vmatprep.subr.bf16.mxu0 %v414_v21  ;;  %552 = vperm.xlu1 %1801, %v466_v41   ;;  %v461_v54 = vld [vmem:[%s2647_s2 + $0x40] sm:$0xff]  ;;  %v462_v55 = vld [vmem:[%s2647_s2 + $0x48] sm:$0xff]  ;;  %v405_v56 = vpack.c.bf16 %v375_v53, %v373_v52  ;;  %v459_v57 = vld [vmem:[%s2647_s2 + $0x30] sm:$0xff]  ;;  %s1870_s28 = scalar_lea.vmem %s2595_s15, 4096  ;;  %p1877_p1 = scmp.lt.s32.totalorder %s2595_s15, %s1875_s13 }
  0x3d   : > { %562 = vperm.xlu0 %1800, %v468_v40   ;;  %v1802_v58 = vld [vmem:[%s2646_s1] sm:$0xff]   ;;  %v460_v59 = vld [vmem:[%s2647_s2 + $0x38] sm:$0xff]  ;;  %v458_v61 = vld [vmem:[%s2647_s2 + $0x28] sm:$0xff]  ;;  %p1871_p8 = scmp.ne.s32.totalorder %s2595_s15, %s1870_s28  ;;  %p1878_p3 = scmp.lt.s32.totalorder %s1876_s30, %s1870_s28 }
  0x3e   : > { %v457_v60 = vld [vmem:[%s2647_s2 + $0x20] sm:$0xff]  ;;  %v455_v62 = vld [vmem:[%s2647_s2 + $0x10] sm:$0xff]  ;;  %v1803_v63 = vld [vmem:[%s2646_s1 + $0x8] sm:$0xff]  }
  0x3f   : > { %748 = vmatpush1.bf16.msra.mxu0 %v413_v27  ;;  %v456_v1 = vld [vmem:[%s2647_s2 + $0x18] sm:$0xff]  ;;  %v453_v2 = vld [vmem:[%s2647_s2] sm:$0xff]  ;;  %v454_v3 = vld [vmem:[%s2647_s2 + $0x8] sm:$0xff]  ;;  %p1872_p12 = pnand %p1871_p8, %p2040_p9  ;;  %p1879_p5 = por %p1878_p3, %p1877_p1 }
  0x40   : > { %749 = vmatprep.subr.bf16.mxu0 %v412_v29  ;;  %542 = vperm.xlu1 %1801, %v464_v49   ;;  %v483_v4 = vld [vmem:[%s2647_s2 + $0xf0] sm:$0xff]  ;;  %v484_v6 = vld [vmem:[%s2647_s2 + $0xf8] sm:$0xff]  ;;  %v481_v7 = vld [vmem:[%s2647_s2 + $0xe0] sm:$0xff] }
  0x41   : > { %537 = vperm.xlu0 %1800, %v463_v48   ;;  %v1804_v5 = vld [vmem:[%s2646_s1 + $0x10] sm:$0xff]   ;;  %v482_v8 = vld [vmem:[%s2647_s2 + $0xe8] sm:$0xff]  ;;  %v1805_v10 = vld [vmem:[%s2646_s1 + $0x18] sm:$0xff]   ;;  %p1873_p0 = pneg %p1872_p12 }
  0x42   : > { %v479_v9 = vld [vmem:[%s2647_s2 + $0xd0] sm:$0xff]  ;;  %v480_v11 = vld [vmem:[%s2647_s2 + $0xd8] sm:$0xff]  ;;  %v477_v12 = vld [vmem:[%s2647_s2 + $0xc0] sm:$0xff] }
  0x43   : > { %750 = vmatpush1.bf16.msra.mxu0 %v411_v33  ;;  %v478_v13 = vld [vmem:[%s2647_s2 + $0xc8] sm:$0xff]  ;;  %v475_v14 = vld [vmem:[%s2647_s2 + $0xb0] sm:$0xff]  ;;  %v1806_v15 = vld [vmem:[%s2646_s1 + $0x20] sm:$0xff]   ;;  %p1880_p6 = pnand %p1879_p5, %p1873_p0 }
  0x44   : > { %751 = vmatprep.subr.bf16.mxu0 %v410_v36  ;;  %532 = vperm.xlu1 %1801, %v462_v55   ;;  %v476_v16 = vld [vmem:[%s2647_s2 + $0xb8] sm:$0xff]  ;;  %v473_v17 = vld [vmem:[%s2647_s2 + $0xa0] sm:$0xff]  ;;  %v474_v18 = vld [vmem:[%s2647_s2 + $0xa8] sm:$0xff] }
  0x45   : > { %527 = vperm.xlu0 %1800, %v461_v54   ;;  %v471_v19 = vld [vmem:[%s2647_s2 + $0x90] sm:$0xff]  ;;  %v1807_v20 = vld [vmem:[%s2646_s1 + $0x28] sm:$0xff]   ;;  %v472_v21 = vld [vmem:[%s2647_s2 + $0x98] sm:$0xff] }
  0x46   : > { %v469_v22 = vld [vmem:[%s2647_s2 + $0x80] sm:$0xff]  ;;  %v470_v23 = vld [vmem:[%s2647_s2 + $0x88] sm:$0xff]  ;;  %v1808_v25 = vld [vmem:[%s2646_s1 + $0x30] sm:$0xff]  }
  0x47   : > { %752 = vmatpush1.bf16.msra.mxu0 %v409_v42  ;;  %v1370_v24 = vld [vmem:[%s2649_s4] sm:$0xff]  ;;  %v1371_v26 = vld [vmem:[%s2649_s4 + $0x8] sm:$0xff]  ;;  %v1372_v27 = vld [vmem:[%s2649_s4 + $0x10] sm:$0xff] }
  0x48   : > { %753 = vmatprep.subr.bf16.mxu0 %v408_v44  ;;  %522 = vperm.xlu1 %1801, %v460_v59   ;;  %v1373_v28 = vld [vmem:[%s2649_s4 + $0x18] sm:$0xff]  ;;  %v1374_v29 = vld [vmem:[%s2649_s4 + $0x20] sm:$0xff]  ;;  %v1375_v31 = vld [vmem:[%s2649_s4 + $0x28] sm:$0xff] }
  0x49   : > { %517 = vperm.xlu0 %1800, %v459_v57   ;;  %v1809_v30 = vld [vmem:[%s2646_s1 + $0x38] sm:$0xff]   ;;  %v1376_v32 = vld [vmem:[%s2649_s4 + $0x30] sm:$0xff]  ;;  %v1378_v34 = vld [vmem:[%s2649_s4 + $0x40] sm:$0xff] }
  0x4a   : > { %v1377_v33 = vld [vmem:[%s2649_s4 + $0x38] sm:$0xff]  ;;  %v1810_v35 = vld [vmem:[%s2646_s1 + $0x40] sm:$0xff]   ;;  %v1379_v36 = vld [vmem:[%s2649_s4 + $0x48] sm:$0xff] }
  0x4b   : > { %754 = vmatpush1.bf16.msra.mxu0 %v407_v50  ;;  %v1380_v37 = vld [vmem:[%s2649_s4 + $0x50] sm:$0xff]  ;;  %v1381_v38 = vld [vmem:[%s2649_s4 + $0x58] sm:$0xff]  ;;  %v1382_v39 = vld [vmem:[%s2649_s4 + $0x60] sm:$0xff] }
  0x4c   : > { %755 = vmatprep.subr.bf16.mxu0 %v406_v51  ;;  %512 = vperm.xlu1 %1801, %v458_v61   ;;  %v1811_v40 = vld [vmem:[%s2646_s1 + $0x48] sm:$0xff]   ;;  %v1384_v42 = vld [vmem:[%s2649_s4 + $0x70] sm:$0xff]  ;;  %v1385_v43 = vld [vmem:[%s2649_s4 + $0x78] sm:$0xff] }
  0x4d   : > { %507 = vperm.xlu0 %1800, %v457_v60   ;;  %v1383_v41 = vld [vmem:[%s2649_s4 + $0x68] sm:$0xff]  ;;  %v1812_v44 = vld [vmem:[%s2646_s1 + $0x50] sm:$0xff]   ;;  %v1813_v45 = vld [vmem:[%s2646_s1 + $0x58] sm:$0xff]  }
  0x4e   : > { %v1814_v46 = vld [vmem:[%s2646_s1 + $0x60] sm:$0xff]   ;;  %v1815_v47 = vld [vmem:[%s2646_s1 + $0x68] sm:$0xff]   ;;  %v1816_v48 = vld [vmem:[%s2646_s1 + $0x70] sm:$0xff]  }
  0x4f   : > { %756 = vmatpush1.bf16.msra.mxu0 %v405_v56  ;;  %v1817_v49 = vld [vmem:[%s2646_s1 + $0x78] sm:$0xff]  }
  0x50   : > { %502 = vperm.xlu1 %1801, %v456_v1  }
  0x51   : > { %497 = vperm.xlu0 %1800, %v455_v62  }
  0x52   : > { %774 = vmatmul.mubr.bf16.vlgmr.msra.gmra.mxu0 %v1802_v58 }
  0x53   : > { %783 = vmatprep.mubr.bf16.mxu0 %v1955_v0 }
  0x54   : > { %492 = vperm.xlu1 %1801, %v454_v3  }
  0x55   : > { %487 = vperm.xlu0 %1800, %v453_v2  }
  0x58   : > { %642 = vperm.xlu1 %1801, %v484_v6  }
  0x59   : > { %637 = vperm.xlu0 %1800, %v483_v4  }
  0x5a   : > { %784 = vmatmul.mubr.bf16.gmra.mxu0 %v1803_v63 }
  0x5b   : > { %793 = vmatprep.mubr.bf16.mxu0 %v1955_v0 }
  0x5c   : > { %632 = vperm.xlu1 %1801, %v482_v8  }
  0x5d   : > { %627 = vperm.xlu0 %1800, %v481_v7  }
  0x60   : > { %622 = vperm.xlu1 %1801, %v480_v11  }
  0x61   : > { %617 = vperm.xlu0 %1800, %v479_v9  }
  0x62   : > { %794 = vmatmul.mubr.bf16.gmra.mxu0 %v1804_v5 }
  0x63   : > { %803 = vmatprep.mubr.bf16.mxu0 %v1955_v0 }
  0x64   : > { %612 = vperm.xlu1 %1801, %v478_v13  }
  0x65   : > { %607 = vperm.xlu0 %1800, %v477_v12  }
  0x68   : > { %602 = vperm.xlu1 %1801, %v476_v16  }
  0x69   : > { %597 = vperm.xlu0 %1800, %v475_v14  }
  0x6a   : > { %804 = vmatmul.mubr.bf16.gmra.mxu0 %v1805_v10 }
  0x6b   : > { %813 = vmatprep.mubr.bf16.mxu0 %v1955_v0 }
  0x6c   : > { %592 = vperm.xlu1 %1801, %v474_v18  }
  0x6d   : > { %587 = vperm.xlu0 %1800, %v473_v17  }
  0x70   : > { %582 = vperm.xlu1 %1801, %v472_v21  }
  0x71   : > { %577 = vperm.xlu0 %1800, %v471_v19  }
  0x72   : > { %814 = vmatmul.mubr.bf16.gmra.mxu0 %v1806_v15 }
  0x73   : > { %823 = vmatprep.mubr.bf16.mxu0 %v1955_v0 }
  0x74   : > { %572 = vperm.xlu1 %1801, %v470_v23  }
  0x75   : > { %567 = vperm.xlu0 %1800, %v469_v22  }
  0x78   : > { %1393 = vperm.xlu1 %1801, %v1371_v26  }
  0x79   : > { %1388 = vperm.xlu0 %1800, %v1370_v24  }
  0x7a   : > { %824 = vmatmul.mubr.bf16.gmra.mxu0 %v1807_v20 }
  0x7b   : > { %833 = vmatprep.mubr.bf16.mxu0 %v1955_v0 }
  0x7c   : > { %1403 = vperm.xlu1 %1801, %v1373_v28  }
  0x7d   : > { %1398 = vperm.xlu0 %1800, %v1372_v27  }
  0x80   : > { %1413 = vperm.xlu1 %1801, %v1375_v31  }
  0x81   : > { %1408 = vperm.xlu0 %1800, %v1374_v29  }
  0x82   : > { %834 = vmatmul.mubr.bf16.gmra.mxu0 %v1808_v25 }
  0x83   : > { %843 = vmatprep.mubr.bf16.mxu0 %v1955_v0 }
  0x84   : > { %1423 = vperm.xlu1 %1801, %v1377_v33  }
  0x85   : > { %1418 = vperm.xlu0 %1800, %v1376_v32  }
  0x88   : > { %1433 = vperm.xlu1 %1801, %v1379_v36  }
  0x89   : > { %1428 = vperm.xlu0 %1800, %v1378_v34  }
  0x8a   : > { %844 = vmatmul.mubr.bf16.gmra.mxu0 %v1809_v30 }
  0x8b   : > { %853 = vmatprep.mubr.bf16.mxu0 %v1955_v0 }
  0x8c   : > { %1443 = vperm.xlu1 %1801, %v1381_v38  }
  0x8d   : > { %1438 = vperm.xlu0 %1800, %v1380_v37  }
  0x90   : > { %1453 = vperm.xlu1 %1801, %v1383_v41  }
  0x91   : > { %1448 = vperm.xlu0 %1800, %v1382_v39  }
  0x92   : > { %854 = vmatmul.mubr.bf16.gmra.mxu0 %v1810_v35 }
  0x93   : > { %863 = vmatprep.mubr.bf16.mxu0 %v1955_v0 }
  0x94   : > { %1463 = vperm.xlu1 %1801, %v1385_v43  }
  0x95   : > { %1458 = vperm.xlu0 %1800, %v1384_v42  }
  0x9a   : > { %864 = vmatmul.mubr.bf16.gmra.mxu0 %v1811_v40 }
  0x9b   : > { %873 = vmatprep.mubr.bf16.mxu0 %v1955_v0 }
  0xa2   : > { %874 = vmatmul.mubr.bf16.gmra.mxu0 %v1812_v44  ;;  %v1820_v44 = vld [vmem:[%s2648_s3 + $0x4] ss:$8 sps:$4 sm:$0xff]  }
  0xa3   : > { %883 = vmatprep.mubr.bf16.mxu0 %v1955_v0  ;;  %1190 = vmatprep.mubr.bf16.mxu1 %v1820_v44 }
  0xaa   : > { %884 = vmatmul.mubr.bf16.gmra.mxu0 %v1813_v45 }
  0xab   : > { %893 = vmatprep.mubr.bf16.mxu0 %v1955_v0 }
  0xb2   : > { %894 = vmatmul.mubr.bf16.gmra.mxu0 %v1814_v46 }
  0xb3   : > { %903 = vmatprep.mubr.bf16.mxu0 %v1955_v0  ;;  %v2329_v51 = vpop.permute.xlu1 %547 }
  0xb4   : > { %v2327_v50 = vpop.permute.xlu0 %557 }
  0xb7   : > { %v2333_v53 = vpop.permute.xlu1 %552 }
  0xb8   : > { %v2331_v52 = vpop.permute.xlu0 %562 }
  0xba   : > { %904 = vmatmul.mubr.bf16.gmra.mxu0 %v1815_v47 }
  0xbb   : > { %913 = vmatprep.mubr.bf16.mxu0 %v1955_v0  ;;  %v2337_v55 = vpop.permute.xlu1 %542 }
  0xbc   : > { %v2335_v54 = vpop.permute.xlu0 %537 }
  0xc0   : > { %v2339_v56 = vpop.permute.xlu0 %527 }
  0xc2   : > { %914 = vmatmul.mubr.bf16.gmra.mxu0 %v1816_v48 }
  0xc3   : > { %923 = vmatprep.mubr.bf16.mxu0 %v1955_v0  ;;  %v2341_v0 = vpop.permute.xlu1 %532 }
  0xc4   : > { %v2343_v57 = vpop.permute.xlu0 %517 }
  0xc7   : > { %v2345_v58 = vpop.permute.xlu1 %522 }
  0xc8   : > { %v2347_v59 = vpop.permute.xlu0 %507 }
  0xca   : > { %924 = vmatmul.mubr.bf16.gmra.mxu0 %v1817_v49 }
  0xcb   : > { %v2349_v60 = vpop.permute.xlu1 %512 }
  0xcc   : > { %v498_v61 = vpop.permute.xlu0 %497 }
  0xcf   : > { %v503_v62 = vpop.permute.xlu1 %502 }
  0xd0   : > { %v488_v63 = vpop.permute.xlu0 %487 }
  0xd3   : > { %v493_v3 = vpop.permute.xlu1 %492 }
  0xd4   : > { %v2369_v35 = vpop.permute.xlu0 %637 }
  0xd7   : > { %v2373_v37 = vpop.permute.xlu1 %642 }
  0xd8   : > { %v2379_v40 = vpop.permute.xlu0 %627 }
  0xdb   : > { %v2383_v42 = vpop.permute.xlu1 %632 }
  0xdc   : > { %v2390_v46 = vpop.permute.xlu0 %617 }
  0xdf   : > { %v2392_v48 = vpop.permute.xlu1 %622 }
 0x112   : > { %v775_v1 = vpop.f32.mrf.mxu0 }
 0x113   : > { %v776_v4 = vadd.f32 %v775_v1, %v488_v63  ;;  %v2396_v1 = vpop.permute.xlu1 %612 }
 0x114   : > { %v777_v2 = vpop.f32.mrf.mxu0 }
 0x115   : > { %v778_v6 = vadd.f32 %v777_v2, %v488_v63  ;;  %v934_v9 = vmax.f32 %v776_v4, 0.0 }
 0x116   : > { %v779_v5 = vpop.f32.mrf.mxu0 }
 0x117   : > { %v780_v7 = vadd.f32 %v779_v5, %v493_v3  ;;  %v935_v13 = vmax.f32 %v778_v6, 0.0  ;;  %v2400_v5 = vpop.permute.xlu1 %602 }
 0x118   : > { %v781_v8 = vpop.f32.mrf.mxu0  ;;  %2663 = vst [vmem:[#allocation11_spill] sm:$0xff] %v2400_v5 }
 0x119   : > { %v936_v10 = vmax.f32 %v780_v7, 0.0  ;;  %v782_v11 = vadd.f32 %v781_v8, %v493_v3 }
 0x11a   : > { %v785_v12 = vpop.f32.mrf.mxu0 }
 0x11b   : > { %v2351_v14 = vpack.c.bf16 %v936_v10, %v934_v9  ;;  %v937_v15 = vmax.f32 %v782_v11, 0.0  ;;  %v786_v18 = vadd.f32 %v785_v12, %v498_v61  ;;  %v2404_v10 = vpop.permute.xlu1 %592 }
 0x11c   : > { %v787_v16 = vpop.f32.mrf.mxu0  ;;  %2665 = vst [vmem:[#allocation13_spill] sm:$0xff] %v2404_v10 }
 0x11d   : > { %v2353_v17 = vpack.c.bf16 %v937_v15, %v935_v13  ;;  %v788_v20 = vadd.f32 %v787_v16, %v498_v61  ;;  %v938_v23 = vmax.f32 %v786_v18, 0.0  ;;  %v2394_v61 = vpop.permute.xlu0 %607 }
 0x11e   : > { %v789_v19 = vpop.f32.mrf.mxu0  ;;  %2661 = vst [vmem:[#allocation9_spill] sm:$0xff] %v2394_v61 }
 0x11f   : > { %v790_v21 = vadd.f32 %v789_v19, %v503_v62  ;;  %v939_v27 = vmax.f32 %v788_v20, 0.0 }
 0x120   : > { %v791_v22 = vpop.f32.mrf.mxu0 }
 0x121   : > { %v940_v24 = vmax.f32 %v790_v21, 0.0  ;;  %v792_v25 = vadd.f32 %v791_v22, %v503_v62  ;;  %v2398_v3 = vpop.permute.xlu0 %597  ;;  %v2412_v21 = vpop.permute.xlu1 %582 }
 0x122   : > { %v2355_v26 = vpop.f32.mrf.mxu0  ;;  %2662 = vst [vmem:[#allocation10_spill] sm:$0xff] %v2398_v3 }
 0x123   : > { %v2357_v28 = vpack.c.bf16 %v940_v24, %v938_v23  ;;  %v941_v29 = vmax.f32 %v792_v25, 0.0 }
 0x124   : > { %v2359_v30 = vpop.f32.mrf.mxu0 }
 0x125   : > { %v2361_v31 = vpack.c.bf16 %v941_v29, %v939_v27  ;;  %v2402_v8 = vpop.permute.xlu0 %587 }
 0x126   : > { %v2363_v32 = vpop.f32.mrf.mxu0  ;;  %2664 = vst [vmem:[#allocation12_spill] sm:$0xff] %v2402_v8 }
 0x128   : > { %v2365_v33 = vpop.f32.mrf.mxu0 }
 0x129   : > { %v2406_v13 = vpop.permute.xlu0 %577 }
 0x12a   : > { %v2367_v34 = vpop.f32.mrf.mxu0 }
 0x12c   : > { %v2371_v36 = vpop.f32.mrf.mxu0 }
 0x12e   : > { %v2375_v38 = vpop.f32.mrf.mxu0 }
 0x130   : > { %v2377_v39 = vpop.f32.mrf.mxu0 }
 0x132   : > { %v2381_v41 = vpop.f32.mrf.mxu0 }
 0x134   : > { %v817_v43 = vpop.f32.mrf.mxu0 }
 0x136   : > { %v2388_v45 = vpop.f32.mrf.mxu0 }
 0x138   : > { %v821_v47 = vpop.f32.mrf.mxu0 }
 0x13a   : > { %v825_v49 = vpop.f32.mrf.mxu0 }
 0x13c   : > { %v827_v62 = vpop.f32.mrf.mxu0 }
 0x13d   : > { %v828_v3 = vadd.f32 %v827_v62, %v2335_v54  ;;  %v818_v62 = vadd.f32 %v817_v43, %v2339_v56 }
 0x13e   : > { %v829_v63 = vpop.f32.mrf.mxu0 }
 0x140   : > { %v831_v2 = vpop.f32.mrf.mxu0 }
 0x141   : > { %v832_v44 = vadd.f32 %v831_v2, %v2337_v55 }
 0x142   : > { %v835_v4 = vpop.f32.mrf.mxu0 }
 0x144   : > { %v837_v6 = vpop.f32.mrf.mxu0 }
 0x145   : > { %v838_v23 = vadd.f32 %v837_v6, %v2329_v51 }
 0x146   : > { %v839_v7 = vpop.f32.mrf.mxu0 }
 0x147   : > { %v840_v25 = vadd.f32 %v839_v7, %v2333_v53  ;;  %v959_v5 = vmax.f32 %v838_v23, 0.0 }
 0x148   : > { %v841_v9 = vpop.f32.mrf.mxu0 }
 0x149   : > { %v842_v16 = vadd.f32 %v841_v9, %v2333_v53  ;;  %v830_v53 = vadd.f32 %v829_v63, %v2337_v55  ;;  %v960_v7 = vmax.f32 %v840_v25, 0.0  ;;  %v955_v55 = vmax.f32 %v828_v3, 0.0 }
 0x14a   : > { %v845_v11 = vpop.f32.mrf.mxu0 }
 0x14b   : > { %v846_v20 = vadd.f32 %v845_v11, %v2327_v50  ;;  %v961_v9 = vmax.f32 %v842_v16, 0.0 }
 0x14c   : > { %v847_v12 = vpop.f32.mrf.mxu0 }
 0x14d   : > { %v848_v18 = vadd.f32 %v847_v12, %v2327_v50  ;;  %v962_v10 = vmax.f32 %v846_v20, 0.0  ;;  %v568_v50 = vpop.permute.xlu0 %567 }
 0x14e   : > { %v849_v15 = vpop.f32.mrf.mxu0 }
 0x14f   : > { %v850_v19 = vadd.f32 %v849_v15, %v2331_v52  ;;  %v963_v8 = vmax.f32 %v848_v18, 0.0  ;;  %v836_v15 = vadd.f32 %v835_v4, %v2329_v51  ;;  %v957_v18 = vmax.f32 %v832_v44, 0.0 }
 0x150   : > { %v851_v22 = vpop.f32.mrf.mxu0  ;;  %v812_v4 = vadd.f32 %v2377_v39, %v2345_v58 }
 0x151   : > { %v852_v24 = vadd.f32 %v851_v22, %v2331_v52  ;;  %v964_v27 = vmax.f32 %v850_v19, 0.0  ;;  %v822_v52 = vadd.f32 %v821_v47, %v2341_v0  ;;  %v573_v19 = vpop.permute.xlu1 %572  ;;  %v1011_v22 = vpack.c.bf16 %v961_v9, %v959_v5 }
 0x152   : > { %v855_v29 = vpop.f32.mrf.mxu0  ;;  %v958_v20 = vmax.f32 %v836_v15, 0.0  ;;  %v820_v5 = vadd.f32 %v2388_v45, %v2341_v0  ;;  %v1009_v39 = vpack.c.bf16 %v957_v18, %v955_v55  ;;  %v951_v15 = vmax.f32 %v818_v62, 0.0 }
 0x153   : > { %v965_v12 = vmax.f32 %v852_v24, 0.0  ;;  %v856_v6 = vadd.f32 %v855_v29, %v568_v50  ;;  %v1012_v16 = vpack.c.bf16 %v964_v27, %v962_v10  ;;  %v953_v10 = vmax.f32 %v822_v52, 0.0 }
 0x154   : > { %v857_v11 = vpop.f32.mrf.mxu0  ;;  %v1010_v27 = vpack.c.bf16 %v960_v7, %v958_v20  ;;  %v949_v52 = vmax.f32 %v812_v4, 0.0  ;;  %v796_v20 = vadd.f32 %v2355_v26, %v2347_v59 }
 0x155   : > { %v1013_v61 = vpack.c.bf16 %v965_v12, %v963_v8  ;;  %v858_v24 = vadd.f32 %v857_v11, %v568_v50  ;;  %v826_v8 = vadd.f32 %v825_v49, %v2335_v54  ;;  %v966_v63 = vmax.f32 %v856_v6, 0.0 }
 0x156   : > { %v859_v2 = vpop.f32.mrf.mxu0  ;;  %v816_v49 = vadd.f32 %v2381_v41, %v2339_v56  ;;  %v808_v12 = vadd.f32 %v2371_v36, %v2343_v57  ;;  %v802_v50 = vadd.f32 %v2365_v33, %v2349_v60  ;;  %v810_v11 = vadd.f32 %v2375_v38, %v2345_v58 }
 0x157   : > { %v860_v51 = vadd.f32 %v859_v2, %v573_v19  ;;  %1158 = vmatprep.subr.bf16.mxu1 %v1013_v61  ;;  %v956_v61 = vmax.f32 %v830_v53, 0.0  ;;  %v967_v44 = vmax.f32 %v858_v24, 0.0  ;;  %v954_v3 = vmax.f32 %v826_v8, 0.0 }
 0x158   : > { %v861_v47 = vpop.f32.mrf.mxu0  ;;  %1159 = vmatpush1.bf16.msra.mxu1 %v1012_v16  ;;  %v952_v6 = vmax.f32 %v820_v5, 0.0  ;;  %v1007_v53 = vpack.c.bf16 %v953_v10, %v951_v15  ;;  %v806_v2 = vadd.f32 %v2367_v34, %v2343_v57  ;;  %v950_v16 = vmax.f32 %v816_v49, 0.0 }
 0x159   : > { %v968_v23 = vmax.f32 %v860_v51, 0.0  ;;  %v862_v25 = vadd.f32 %v861_v47, %v573_v19  ;;  %1160 = vmatprep.subr.bf16.mxu1 %v1011_v22  ;;  %v1008_v56 = vpack.c.bf16 %v956_v61, %v954_v3  ;;  %v798_v19 = vadd.f32 %v2359_v30, %v2347_v59 }
 0x15a   : > { %v865_v29 = vpop.f32.mrf.mxu0  ;;  %v947_v18 = vmax.f32 %v808_v12, 0.0  ;;  %v945_v24 = vmax.f32 %v802_v50, 0.0  ;;  %v948_v51 = vmax.f32 %v810_v11, 0.0  ;;  %v1006_v4 = vpack.c.bf16 %v952_v6, %v950_v16 }
 0x15b   : > { %v2428_v43 = vpack.c.bf16 %v968_v23, %v966_v63  ;;  %v969_v54 = vmax.f32 %v862_v25, 0.0  ;;  %v866_v45 = vadd.f32 %v865_v29, %v2406_v13  ;;  %v946_v47 = vmax.f32 %v806_v2, 0.0 }
 0x15c   : > { %v867_v9 = vpop.f32.mrf.mxu0  ;;  %1161 = vmatpush1.bf16.msra.mxu1 %v1010_v27  ;;  %v1005_v30 = vpack.c.bf16 %v949_v52, %v947_v18  ;;  %v942_v5 = vmax.f32 %v796_v20, 0.0 }
 0x15d   : > { %v2434_v0 = vpack.c.bf16 %v969_v54, %v967_v44  ;;  %1162 = vmatprep.subr.bf16.mxu1 %v1009_v39  ;;  %v868_v7 = vadd.f32 %v867_v9, %v2406_v13  ;;  %v970_v58 = vmax.f32 %v866_v45, 0.0  ;;  %v800_v13 = vadd.f32 %v2363_v32, %v2349_v60 }
 0x15e   : > { %v869_v41 = vpop.f32.mrf.mxu0  ;;  %v1004_v32 = vpack.c.bf16 %v948_v51, %v946_v47  ;;  %v2666_v47 = vld [vmem:[#allocation9_spill] sm:$0xff] }
 0x15f   : > { %v870_v36 = vadd.f32 %v869_v41, %v2412_v21  ;;  %v971_v8 = vmax.f32 %v868_v7, 0.0  ;;  %v944_v60 = vmax.f32 %v800_v13, 0.0 }
 0x160   : > { %v871_v33 = vpop.f32.mrf.mxu0  ;;  %1163 = vmatpush1.bf16.msra.mxu1 %v1008_v56 }
 0x161   : > { %v972_v38 = vmax.f32 %v870_v36, 0.0  ;;  %v872_v22 = vadd.f32 %v871_v33, %v2412_v21  ;;  %1164 = vmatprep.subr.bf16.mxu1 %v1007_v53  ;;  %v943_v21 = vmax.f32 %v798_v19, 0.0  ;;  %v1002_v61 = vpack.c.bf16 %v944_v60, %v942_v5 }
 0x162   : > { %v2450_v62 = vpop.f32.mrf.mxu0 }
 0x163   : > { %v2452_v57 = vpack.c.bf16 %v972_v38, %v970_v58  ;;  %v973_v34 = vmax.f32 %v872_v22, 0.0  ;;  %v1003_v25 = vpack.c.bf16 %v945_v24, %v943_v21 }
 0x164   : > { %v2456_v55 = vpop.f32.mrf.mxu0  ;;  %1165 = vmatpush1.bf16.msra.mxu1 %v1006_v4 }
 0x165   : > { %v2458_v63 = vpack.c.bf16 %v973_v34, %v971_v8  ;;  %1166 = vmatprep.subr.bf16.mxu1 %v1005_v30 }
 0x166   : > { %v2460_v23 = vpop.f32.mrf.mxu0 }
 0x168   : > { %v2462_v10 = vpop.f32.mrf.mxu0  ;;  %1167 = vmatpush1.bf16.msra.mxu1 %v1004_v32 }
 0x169   : > { %1168 = vmatprep.subr.bf16.mxu1 %v1003_v25 }
 0x16a   : > { %v2464_v59 = vpop.f32.mrf.mxu0 }
 0x16c   : > { %v2466_v26 = vpop.f32.mrf.mxu0  ;;  %1169 = vmatpush1.bf16.msra.mxu1 %v1002_v61 }
 0x16d   : > { %1170 = vmatprep.subr.bf16.mxu1 %v2361_v31 }
 0x16e   : > { %v2469_v27 = vpop.f32.mrf.mxu0 }
 0x170   : > { %v891_v29 = vpop.f32.mrf.mxu0  ;;  %1171 = vmatpush1.bf16.msra.mxu1 %v2357_v28 }
 0x171   : > { %1172 = vmatprep.subr.bf16.mxu1 %v2353_v17 }
 0x172   : > { %v895_v39 = vpop.f32.mrf.mxu0 }
 0x174   : > { %v897_v44 = vpop.f32.mrf.mxu0  ;;  %1173 = vmatpush1.bf16.msra.mxu1 %v2351_v14 }
 0x176   : > { %v899_v54 = vpop.f32.mrf.mxu0 }
 0x177   : > { %v900_v60 = vadd.f32 %v899_v54, %v2396_v1  ;;  %v2669_v54 = vld [vmem:[#allocation13_spill] sm:$0xff] }
 0x178   : > { %v901_v49 = vpop.f32.mrf.mxu0 }
 0x17a   : > { %v905_v3 = vpop.f32.mrf.mxu0 }
 0x17b   : > { %v906_v34 = vadd.f32 %v905_v3, %v2390_v46 }
 0x17c   : > { %v907_v9 = vpop.f32.mrf.mxu0 }
 0x17d   : > { %v908_v13 = vadd.f32 %v907_v9, %v2390_v46 }
 0x17e   : > { %v909_v12 = vpop.f32.mrf.mxu0 }
 0x17f   : > { %v910_v51 = vadd.f32 %v909_v12, %v2392_v48  ;;  %v987_v21 = vmax.f32 %v908_v13, 0.0  ;;  %v986_v12 = vmax.f32 %v906_v34, 0.0  ;;  %v1839_v13 = vld [vmem:[%s2648_s3 + $0x74] ss:$8 sps:$4 sm:$0xff]  }
 0x180   : > { %v911_v15 = vpop.f32.mrf.mxu0 }
 0x181   : > { %v912_v16 = vadd.f32 %v911_v15, %v2392_v48  ;;  %v988_v32 = vmax.f32 %v910_v51, 0.0  ;;  %v2667_v48 = vld [vmem:[#allocation11_spill] sm:$0xff]  ;;  %v2668_v15 = vld [vmem:[#allocation10_spill] sm:$0xff] }
 0x182   : > { %v915_v45 = vpop.f32.mrf.mxu0  ;;  %v892_v5 = vadd.f32 %v891_v29, %v2667_v48  ;;  %v888_v46 = vadd.f32 %v2466_v26, %v2668_v15 }
 0x183   : > { %v916_v38 = vadd.f32 %v915_v45, %v2379_v40  ;;  %v984_v45 = vmax.f32 %v900_v60, 0.0 }
 0x184   : > { %v917_v50 = vpop.f32.mrf.mxu0  ;;  %v981_v29 = vmax.f32 %v892_v5, 0.0 }
 0x185   : > { %v918_v7 = vadd.f32 %v917_v50, %v2379_v40  ;;  %v990_v20 = vmax.f32 %v916_v38, 0.0  ;;  %v898_v40 = vadd.f32 %v897_v44, %v2666_v47  ;;  %v890_v44 = vadd.f32 %v2469_v27, %v2667_v48  ;;  %v1836_v38 = vld [vmem:[%s2648_s3 + $0x64] ss:$8 sps:$4 sm:$0xff]  }
 0x186   : > { %v919_v31 = vpop.f32.mrf.mxu0  ;;  %v882_v50 = vadd.f32 %v2462_v10, %v2669_v54  ;;  %v880_v27 = vadd.f32 %v2460_v23, %v2669_v54  ;;  %v1821_v23 = vld [vmem:[%s2648_s3 + $0x14] ss:$8 sps:$4 sm:$0xff]  }
 0x187   : > { %v920_v19 = vadd.f32 %v919_v31, %v2383_v42  ;;  %v991_v24 = vmax.f32 %v918_v7, 0.0  ;;  %v983_v3 = vmax.f32 %v898_v40, 0.0 }
 0x188   : > { %v921_v11 = vpop.f32.mrf.mxu0 }
 0x189   : > { %v922_v28 = vadd.f32 %v921_v11, %v2383_v42  ;;  %v992_v4 = vmax.f32 %v920_v19, 0.0  ;;  %v989_v42 = vmax.f32 %v912_v16, 0.0  ;;  %v1830_v16 = vld [vmem:[%s2648_s3 + $0x44] ss:$8 sps:$4 sm:$0xff]  }
 0x18a   : > { %v925_v6 = vpop.f32.mrf.mxu0 }
 0x18b   : > { %v926_v14 = vadd.f32 %v925_v6, %v2369_v35  ;;  %v993_v33 = vmax.f32 %v922_v28, 0.0  ;;  %v1026_v25 = vpack.c.bf16 %v992_v4, %v990_v20  ;;  %v1025_v9 = vpack.c.bf16 %v989_v42, %v987_v21  ;;  %v2670_v6 = vld [vmem:[#allocation12_spill] sm:$0xff]  ;;  %v1394_v42 = vpop.permute.xlu1 %1393 }
 0x18c   : > { %v927_v56 = vpop.f32.mrf.mxu0  ;;  %v878_v26 = vadd.f32 %v2456_v55, %v2670_v6  ;;  %v876_v10 = vadd.f32 %v2450_v62, %v2670_v6  ;;  %v1818_v62 = vld [vmem:[%s2648_s3] ss:$8 sps:$4 sm:$0xff]  }
 0x18d   : > { %v928_v17 = vadd.f32 %v927_v56, %v2369_v35  ;;  %v994_v22 = vmax.f32 %v926_v14, 0.0  ;;  %v1027_v8 = vpack.c.bf16 %v993_v33, %v991_v24  ;;  %v979_v56 = vmax.f32 %v888_v46, 0.0  ;;  %v1832_v33 = vld [vmem:[%s2648_s3 + $0x40] ss:$8 sps:$4 sm:$0xff]   ;;  %v1841_v24 = vld [vmem:[%s2648_s3 + $0x70] ss:$8 sps:$4 sm:$0xff]  }
 0x18e   : > { %v929_v41 = vpop.f32.mrf.mxu0  ;;  %v974_v55 = vmax.f32 %v876_v10, 0.0 }
 0x18f   : > { %v930_v52 = vadd.f32 %v929_v41, %v2373_v37  ;;  %v995_v18 = vmax.f32 %v928_v17, 0.0  ;;  %v980_v41 = vmax.f32 %v890_v44, 0.0  ;;  %v977_v17 = vmax.f32 %v882_v50, 0.0  ;;  %v1404_v48 = vpop.permute.xlu1 %1403 }
 0x190   : > { %v931_v53 = vpop.f32.mrf.mxu0 }
 0x191   : > { %v932_v36 = vadd.f32 %v931_v53, %v2373_v37  ;;  %v996_v2 = vmax.f32 %v930_v52, 0.0  ;;  %v902_v37 = vadd.f32 %v901_v49, %v2396_v1  ;;  %v896_v49 = vadd.f32 %v895_v39, %v2666_v47 }
 0x192   : > { %v1024_v1 = vpack.c.bf16 %v988_v32, %v986_v12  ;;  %v886_v39 = vadd.f32 %v2464_v59, %v2668_v15  ;;  %v1021_v52 = vpack.c.bf16 %v981_v29, %v979_v56  ;;  %v975_v59 = vmax.f32 %v878_v26, 0.0 }
 0x193   : > { %v997_v58 = vmax.f32 %v932_v36, 0.0  ;;  %v1028_v30 = vpack.c.bf16 %v996_v2, %v994_v22  ;;  %v985_v61 = vmax.f32 %v902_v37, 0.0  ;;  %v982_v11 = vmax.f32 %v896_v49, 0.0  ;;  %v1829_v2 = vld [vmem:[%s2648_s3 + $0x30] ss:$8 sps:$4 sm:$0xff]  }
 0x194   : > { %v978_v14 = vmax.f32 %v886_v39, 0.0  ;;  %v976_v53 = vmax.f32 %v880_v27, 0.0  ;;  %v1019_v36 = vpack.c.bf16 %v977_v17, %v975_v59  ;;  %v1838_v22 = vld [vmem:[%s2648_s3 + $0x60] ss:$8 sps:$4 sm:$0xff]  }
 0x195   : > { %v1029_v35 = vpack.c.bf16 %v997_v58, %v995_v18  ;;  %v1023_v31 = vpack.c.bf16 %v985_v61, %v983_v3  ;;  %v1022_v28 = vpack.c.bf16 %v984_v45, %v982_v11  ;;  %v1833_v18 = vld [vmem:[%s2648_s3 + $0x54] ss:$8 sps:$4 sm:$0xff]   ;;  %v1835_v58 = vld [vmem:[%s2648_s3 + $0x50] ss:$8 sps:$4 sm:$0xff]   ;;  %v1414_v45 = vpop.permute.xlu1 %1413 }
 0x196   : > { %v1020_v7 = vpack.c.bf16 %v980_v41, %v978_v14  ;;  %v1018_v19 = vpack.c.bf16 %v976_v53, %v974_v55 }
 0x197   : > { %1174 = vmatprep.subr.bf16.mxu1 %v1029_v35  ;;  %v1389_v35 = vpop.permute.xlu0 %1388 }
 0x198   : > { %1175 = vmatpush2.bf16.msra.mxu1 %v1028_v30 }
 0x199   : > { %1176 = vmatprep.subr.bf16.mxu1 %v1027_v8  ;;  %v1424_v56 = vpop.permute.xlu1 %1423 }
 0x19b   : > { %v1399_v40 = vpop.permute.xlu0 %1398 }
 0x19c   : > { %1177 = vmatpush2.bf16.msra.mxu1 %v1026_v25 }
 0x19d   : > { %1178 = vmatprep.subr.bf16.mxu1 %v1025_v9 }
 0x19f   : > { %v1409_v12 = vpop.permute.xlu0 %1408 }
 0x1a0   : > { %1179 = vmatpush2.bf16.msra.mxu1 %v1024_v1 }
 0x1a1   : > { %1180 = vmatprep.subr.bf16.mxu1 %v1023_v31 }
 0x1a3   : > { %v1419_v31 = vpop.permute.xlu0 %1418 }
 0x1a4   : > { %1181 = vmatpush2.bf16.msra.mxu1 %v1022_v28 }
 0x1a5   : > { %1182 = vmatprep.subr.bf16.mxu1 %v1021_v52 }
 0x1a7   : > { %v1429_v52 = vpop.permute.xlu0 %1428 }
 0x1a8   : > { %1183 = vmatpush2.bf16.msra.mxu1 %v1020_v7  ;;  %v1434_v7 = vpop.permute.xlu1 %1433 }
 0x1a9   : > { %1184 = vmatprep.subr.bf16.mxu1 %v1019_v36 }
 0x1ac   : > { %1185 = vmatpush2.bf16.msra.mxu1 %v1018_v19 }
 0x1ad   : > { %1186 = vmatprep.subr.bf16.mxu1 %v2458_v63  ;;  %v1823_v63 = vld [vmem:[%s2648_s3 + $0x10] ss:$8 sps:$4 sm:$0xff]  }
 0x1b0   : > { %1187 = vmatpush2.bf16.msra.mxu1 %v2452_v57  ;;  %v1827_v57 = vld [vmem:[%s2648_s3 + $0x34] ss:$8 sps:$4 sm:$0xff]  }
 0x1b1   : > { %1188 = vmatprep.subr.bf16.mxu1 %v2434_v0  ;;  %v1824_v0 = vld [vmem:[%s2648_s3 + $0x24] ss:$8 sps:$4 sm:$0xff]  }
 0x1b4   : > { %1189 = vmatpush2.bf16.msra.mxu1 %v2428_v43  ;;  %v1826_v43 = vld [vmem:[%s2648_s3 + $0x20] ss:$8 sps:$4 sm:$0xff]  }
 0x1b7   : > { %1191 = vmatmul.mubr.bf16.vlgmr.msra.gmra.mxu1 %v1818_v62 }
 0x1b8   : > { %1200 = vmatprep.mubr.bf16.mxu1 %v1821_v23  ;;  %v1439_v23 = vpop.permute.xlu0 %1438 }
 0x1bf   : > { %1201 = vmatmul.mubr.bf16.gmra.mxu1 %v1823_v63 }
 0x1c0   : > { %1210 = vmatprep.mubr.bf16.mxu1 %v1824_v0 }
 0x1c7   : > { %1211 = vmatmul.mubr.bf16.gmra.mxu1 %v1826_v43 }
 0x1c8   : > { %1220 = vmatprep.mubr.bf16.mxu1 %v1827_v57 }
 0x1cf   : > { %1221 = vmatmul.mubr.bf16.gmra.mxu1 %v1829_v2  ;;  %v1444_v2 = vpop.permute.xlu1 %1443 }
 0x1d0   : > { %1230 = vmatprep.mubr.bf16.mxu1 %v1830_v16 }
 0x1d7   : > { %1231 = vmatmul.mubr.bf16.gmra.mxu1 %v1832_v33 }
 0x1d8   : > { %1240 = vmatprep.mubr.bf16.mxu1 %v1833_v18 }
 0x1df   : > { %1241 = vmatmul.mubr.bf16.gmra.mxu1 %v1835_v58 }
 0x1e0   : > { %1250 = vmatprep.mubr.bf16.mxu1 %v1836_v38  ;;  %v1449_v38 = vpop.permute.xlu0 %1448 }
 0x1e7   : > { %1251 = vmatmul.mubr.bf16.gmra.mxu1 %v1838_v22 }
 0x1e8   : > { %1260 = vmatprep.mubr.bf16.mxu1 %v1839_v13 }
 0x1ef   : > { %1261 = vmatmul.mubr.bf16.gmra.mxu1 %v1841_v24 }
 0x277   : > { %v1192_v51 = vpop.f32.mrf.mxu1 }
 0x278   : > { %v1466_v4 = vadd.f32 %v1389_v35, %v1192_v51  ;;  %v1454_v51 = vpop.permute.xlu1 %1453 }
 0x279   : > { %v1194_v30 = vpop.f32.mrf.mxu1 }
 0x27a   : > { %1498 = vst [vmem:[%s2556_s25] sm:$0xff] %v1466_v4  ;;  %v1467_v37 = vadd.f32 %v1389_v35, %v1194_v30 }
 0x27b   : > { %v1196_v8 = vpop.f32.mrf.mxu1 }
 0x27c   : > { %1499 = vst [vmem:[%s2556_s25 + $0x8] sm:$0xff] %v1467_v37  ;;  %v1468_v34 = vadd.f32 %v1394_v42, %v1196_v8  ;;  %v1459_v8 = vpop.permute.xlu0 %1458 }
 0x27d   : > { %v1198_v20 = vpop.f32.mrf.mxu1 }
 0x27e   : > { %1500 = vst [vmem:[%s2556_s25 + $0x10] sm:$0xff] %v1468_v34  ;;  %v1469_v47 = vadd.f32 %v1394_v42, %v1198_v20 }
 0x27f   : > { %v1202_v21 = vpop.f32.mrf.mxu1 }
 0x280   : > { %1501 = vst [vmem:[%s2556_s25 + $0x18] sm:$0xff] %v1469_v47  ;;  %v1470_v60 = vadd.f32 %v1399_v40, %v1202_v21  ;;  %v1464_v21 = vpop.permute.xlu1 %1463 }
 0x281   : > { %v1204_v32 = vpop.f32.mrf.mxu1 }
 0x282   : > { %1502 = vst [vmem:[%s2556_s25 + $0x20] sm:$0xff] %v1470_v60  ;;  %v1471_v25 = vadd.f32 %v1399_v40, %v1204_v32 }
 0x283   : > { %v1206_v5 = vpop.f32.mrf.mxu1 }
 0x284   : > { %1503 = vst [vmem:[%s2556_s25 + $0x28] sm:$0xff] %v1471_v25  ;;  %v1472_v61 = vadd.f32 %v1404_v48, %v1206_v5 }
 0x285   : > { %v1208_v9 = vpop.f32.mrf.mxu1 }
 0x286   : > { %1504 = vst [vmem:[%s2556_s25 + $0x30] sm:$0xff] %v1472_v61  ;;  %v1473_v49 = vadd.f32 %v1404_v48, %v1208_v9 }
 0x287   : > { %v1212_v15 = vpop.f32.mrf.mxu1 }
 0x288   : > { %1505 = vst [vmem:[%s2556_s25 + $0x38] sm:$0xff] %v1473_v49  ;;  %v1474_v46 = vadd.f32 %v1409_v12, %v1212_v15 }
 0x289   : > { %v1214_v3 = vpop.f32.mrf.mxu1 }
 0x28a   : > { %1506 = vst [vmem:[%s2556_s25 + $0x40] sm:$0xff] %v1474_v46  ;;  %v1475_v44 = vadd.f32 %v1409_v12, %v1214_v3 }
 0x28b   : > { %v1216_v1 = vpop.f32.mrf.mxu1 }
 0x28c   : > { %1507 = vst [vmem:[%s2556_s25 + $0x48] sm:$0xff] %v1475_v44  ;;  %v1476_v54 = vadd.f32 %v1414_v45, %v1216_v1 }
 0x28d   : > { %v1218_v50 = vpop.f32.mrf.mxu1 }
 0x28e   : > { %1508 = vst [vmem:[%s2556_s25 + $0x50] sm:$0xff] %v1476_v54  ;;  %v1477_v29 = vadd.f32 %v1414_v45, %v1218_v50 }
 0x28f   : > { %v1222_v39 = vpop.f32.mrf.mxu1 }
 0x290   : > { %1509 = vst [vmem:[%s2556_s25 + $0x58] sm:$0xff] %v1477_v29  ;;  %v1478_v11 = vadd.f32 %v1419_v31, %v1222_v39 }
 0x291   : > { %v1224_v6 = vpop.f32.mrf.mxu1 }
 0x292   : > { %1510 = vst [vmem:[%s2556_s25 + $0x60] sm:$0xff] %v1478_v11  ;;  %v1479_v26 = vadd.f32 %v1419_v31, %v1224_v6 }
 0x293   : > { %v1226_v27 = vpop.f32.mrf.mxu1 }
 0x294   : > { %1511 = vst [vmem:[%s2556_s25 + $0x68] sm:$0xff] %v1479_v26  ;;  %v1480_v41 = vadd.f32 %v1424_v56, %v1226_v27 }
 0x295   : > { %v1228_v28 = vpop.f32.mrf.mxu1 }
 0x296   : > { %1512 = vst [vmem:[%s2556_s25 + $0x70] sm:$0xff] %v1480_v41  ;;  %v1481_v17 = vadd.f32 %v1424_v56, %v1228_v28 }
 0x297   : > { %v1232_v10 = vpop.f32.mrf.mxu1 }
 0x298   : > { %1513 = vst [vmem:[%s2556_s25 + $0x78] sm:$0xff] %v1481_v17  ;;  %v1482_v14 = vadd.f32 %v1429_v52, %v1232_v10 }
 0x299   : > { %v1234_v59 = vpop.f32.mrf.mxu1 }
 0x29a   : > { %1514 = vst [vmem:[%s2556_s25 + $0x80] sm:$0xff] %v1482_v14  ;;  %v1483_v53 = vadd.f32 %v1429_v52, %v1234_v59 }
 0x29b   : > { %v1236_v36 = vpop.f32.mrf.mxu1 }
 0x29c   : > { %1515 = vst [vmem:[%s2556_s25 + $0x88] sm:$0xff] %v1483_v53  ;;  %v1484_v55 = vadd.f32 %v1434_v7, %v1236_v36 }
 0x29d   : > { %v1238_v19 = vpop.f32.mrf.mxu1 }
 0x29e   : > { %1516 = vst [vmem:[%s2556_s25 + $0x90] sm:$0xff] %v1484_v55  ;;  %v1485_v62 = vadd.f32 %v1434_v7, %v1238_v19 }
 0x29f   : > { %v1242_v63 = vpop.f32.mrf.mxu1 }
 0x2a0   : > { %1517 = vst [vmem:[%s2556_s25 + $0x98] sm:$0xff] %v1485_v62  ;;  %v1486_v0 = vadd.f32 %v1439_v23, %v1242_v63 }
 0x2a1   : > { %v1244_v43 = vpop.f32.mrf.mxu1 }
 0x2a2   : > { %1518 = vst [vmem:[%s2556_s25 + $0xa0] sm:$0xff] %v1486_v0  ;;  %v1487_v57 = vadd.f32 %v1439_v23, %v1244_v43 }
 0x2a3   : > { %v1246_v16 = vpop.f32.mrf.mxu1 }
 0x2a4   : > { %1519 = vst [vmem:[%s2556_s25 + $0xa8] sm:$0xff] %v1487_v57  ;;  %v1488_v33 = vadd.f32 %v1444_v2, %v1246_v16 }
 0x2a5   : > { %v1248_v18 = vpop.f32.mrf.mxu1 }
 0x2a6   : > { %1520 = vst [vmem:[%s2556_s25 + $0xb0] sm:$0xff] %v1488_v33  ;;  %v1489_v58 = vadd.f32 %v1444_v2, %v1248_v18 }
 0x2a7   : > { %v1252_v22 = vpop.f32.mrf.mxu1 }
 0x2a8   : > { %1521 = vst [vmem:[%s2556_s25 + $0xb8] sm:$0xff] %v1489_v58  ;;  %v1490_v13 = vadd.f32 %v1449_v38, %v1252_v22 }
 0x2a9   : > { %v1254_v24 = vpop.f32.mrf.mxu1 }
 0x2aa   : > { %1522 = vst [vmem:[%s2556_s25 + $0xc0] sm:$0xff] %v1490_v13  ;;  %v1491_v35 = vadd.f32 %v1449_v38, %v1254_v24 }
 0x2ab   : > { %v1256_v4 = vpop.f32.mrf.mxu1 }
 0x2ac   : > { %1523 = vst [vmem:[%s2556_s25 + $0xc8] sm:$0xff] %v1491_v35  ;;  %v1492_v30 = vadd.f32 %v1454_v51, %v1256_v4 }
 0x2ad   : > { %v1258_v37 = vpop.f32.mrf.mxu1 }
 0x2ae   : > { %1524 = vst [vmem:[%s2556_s25 + $0xd0] sm:$0xff] %v1492_v30  ;;  %v1493_v42 = vadd.f32 %v1454_v51, %v1258_v37 }
 0x2af   : > { %v1262_v34 = vpop.f32.mrf.mxu1 }
 0x2b0   : > { %1525 = vst [vmem:[%s2556_s25 + $0xd8] sm:$0xff] %v1493_v42  ;;  %v1494_v20 = vadd.f32 %v1459_v8, %v1262_v34 }
 0x2b1   : > { %v1264_v47 = vpop.f32.mrf.mxu1 }
 0x2b2   : > { %1526 = vst [vmem:[%s2556_s25 + $0xe0] sm:$0xff] %v1494_v20  ;;  %v1495_v40 = vadd.f32 %v1459_v8, %v1264_v47 }
 0x2b3   : > { %v1266_v60 = vpop.f32.mrf.mxu1 }
 0x2b4   : > { %1527 = vst [vmem:[%s2556_s25 + $0xe8] sm:$0xff] %v1495_v40  ;;  %v1496_v32 = vadd.f32 %v1464_v21, %v1266_v60 }
 0x2b5   : > { %v1268_v25 = vpop.f32.mrf.mxu1 }
 0x2b6   : > { %1528 = vst [vmem:[%s2556_s25 + $0xf0] sm:$0xff] %v1496_v32  ;;  %v1497_v48 = vadd.f32 %v1464_v21, %v1268_v25 }
 0x2b8   : > { %1529 = vst [vmem:[%s2556_s25 + $0xf8] sm:$0xff] %v1497_v48 }
 0x2b9   : > { %1883 = shalt.err (!%p1880_p6)
}
 0x2ba   : > { %s1884_s14 = scalar_lea.hbm %s2593_s10, 4096  ;;  %s1888_s24 = scalar_lea.hbm %s2650_s5, 8192 }
 0x2bb   : > { %p1885_p7 = scmp.ne.s32.totalorder %s2593_s10, %s1884_s14  ;;  %p1889_p13 = scmp.lt.s32.totalorder %s2593_s10, %s2650_s5 }
 0x2bc   : > { %p1890_p2 = scmp.lt.s32.totalorder %s1888_s24, %s1884_s14 }
 0x2bd   : > { %p1886_p10 = pnand %p1885_p7, %p2040_p9 }
 0x2be   : > { %p1891_p8 = por %p1890_p2, %p1889_p13 }
 0x2bf   : > { %p1887_p4 = pneg %p1886_p10 }
 0x2c1   : > { %p1892_p12 = pnand %p1891_p8, %p1887_p4 }
 0x2c3   : > { %1895 = shalt.err (!%p1892_p12)
}
 0x2c4   : > { %s1957_s27 = smov 256   ;;  %s1958_s29 = smov 16  }
 0x2c5   : > { %1735 = dma.vmem_to_hbm [thread:$0]  (%p2040_p9), %s2595_s15, 4096, %s2593_s10, %s1531_s21, %s1957_s27, %s1957_s27, %s1958_s29  }
 0x2c6 PF: > { %s1561_s28 = sand.u32 1, %s1930_s18   ;;  %p2671_p0 = scmp.ge.s32.totalorder %s1950_s23, 2 }
 0x2c7   : > { %s1562_s9 = scalar_lea.sflag [#allocation5], %s1561_s28 }
 0x2c8   : > { %p1742_p1 = pnand %p2671_p0, %p2047_p11 }
 0x2ca   : > { %p1743_p3 = pneg %p1742_p1 }
 0x2cc   : > { %1925 = dma.done.wait (%p1743_p3), %s1562_s9, 4096  }
 0x2cd   : > { %1927 = vsyncadd (%p1743_p3), %s1562_s9, 4294963200  ;;  %s21_s23 = sadd.s32 1, %s1950_s23   ;;  %s2672_s18 = smov %s1934_s19 }
 0x2ce   : > { %p18_p5 = scmp.ge.s32.totalorder %s21_s23, 4   ;;  %s2673_s19 = smov %s1938_s20 }
 0x2cf   : > { %s2674_s20 = smov %s2045_s7  ;;  %s2675_s21 = smov %s1946_s22 }
 0x2d0   : > { %s2676_s22 = smov %s2678_s26  ;;  %20 = sbr.rel (!%p18_p5) target bundleno = 6 (0x6), region = 102 }
 0x2d5   :  { %1567 = vsyncpa [#allocation4], 1 }
 0x2d6   :  { %1569 = vsyncpa [#allocation4 + $0x1], 1 }
 0x2d7   :  { %1570 = vsyncpa [#allocation5], 1 }
 0x2d8   :  { %1572 = vsyncpa [#allocation5 + $0x1], 1 }

// kernel: tpu_custom_call.1
= control target key start
LH: loop header
LB: loop body
LE: loop exit
PB: predicated region body
PF: predicated region fallthrough
CT: control target
= control target key end

     0   :  { %10 = vsyncpa [#allocation4], 0  ;;  %s2645_s0 = inlined_call_operand.hbm [shape: f32[2,128,256], index: 0, kind: input, shape index: {}]   ;;  %s2646_s1 = inlined_call_operand.vmem [shape: bf16[256,128], index: 1, kind: input, shape index: {}]   ;;  %s2647_s2 = inlined_call_operand.vmem [shape: f32[256,1], index: 2, kind: input, shape index: {}]   ;;  %s2648_s3 = inlined_call_operand.vmem [shape: bf16[128,256], index: 3, kind: input, shape index: {}]   ;;  %s2649_s4 = inlined_call_operand.vmem [shape: f32[128,1], index: 4, kind: input, shape index: {}]   ;;  %s2650_s5 = inlined_call_operand.hbm [shape: f32[2,128,256], index: 5, kind: output, shape index: {}]  }
   0x1   :  { %12 = vsyncpa [#allocation4 + $0x1], 0 }
   0x2   :  { %13 = vsyncpa [#allocation5], 0 }
   0x3   :  { %15 = vsyncpa [#allocation5 + $0x1], 0  ;;  %s1989_s18 = smov 0   ;;  %s1991_s19 = smov 0  }
   0x4   :  { %s1993_s20 = smov 0   ;;  %s1995_s21 = smov 0  }
   0x5   :  { %s1997_s22 = smov 0   ;;  %s1999_s23 = smov 0  }
   0x6 LB: > { %s1681_s24 = sadd.s32 4294967295, %s1950_s23   ;;  %s1682_s25 = sadd.s32 4294967294, %s1950_s23   ;;  %s1950_s23 = sphi %s1999_s23, %s21_s23   ;;  %s1946_s22 = sphi %s1997_s22, %s2676_s22   ;;  %s1942_s21 = sphi %s1995_s21, %s2675_s21   ;;  %s1938_s20 = sphi %s1993_s20, %s2674_s20   ;;  %s1934_s19 = sphi %s1991_s19, %s2673_s19   ;;  %s1930_s18 = sphi %s1989_s18, %s2672_s18  }
   0x7   : > { %s40_s26 = sadd.s32 1, %s1946_s22  ;;  %s49_s27 = sadd.s32 1, %s1938_s20 }
   0x8   : > { %p42_p0 = scmp.ge.s32.totalorder %s40_s26, 2  ;;  %p56_p1 = scmp.ne.s32.totalorder %s1938_s20, %s1934_s19 }
   0x9   : > { %p57_p2 = scmp.eq.s32.totalorder %s1950_s23, 0  ;;  %p62_p3 = scmp.ne.s32.totalorder %s1934_s19, %s1930_s18 }
   0xa   : > { %s2678_s26 = smov (%p42_p0, %s40_s26), 0  ;;  %p63_p5 = scmp.eq.s32.totalorder %s1681_s24, 0 }
   0xb   : > { %p2030_p4 = por %p57_p2, %p56_p1  ;;  %s44_s29 = ssub.s32 %s1946_s22, %s2678_s26 }
   0xc   : > { %p187_p6 = scmp.eq.s32.totalorder %s1681_s24, 1  ;;  %p47_p7 = scmp.eq.s32.totalorder %s44_s29, 0 }
   0xd   : > { %p2036_p8 = por %p63_p5, %p62_p3  ;;  %p193_p10 = scmp.eq.s32.totalorder %s1682_s25, 1 }
   0xe   : > { %p2040_p9 = por %p187_p6, %p56_p1  ;;  %p1745_p13 = scmp.lt.s32.totalorder %s1950_s23, 2 }
   0xf   : > { %s2045_s7 = scalar_select %p47_p7, %s1938_s20, %s49_s27  }
  0x10   : > { %p2047_p11 = por %p193_p10, %p62_p3  ;;  %s243_s9 = sand.u32 1, %s1938_s20  }
  0x11   : > { %s1688_s10 = sshll.u32 %s243_s9, 8  ;;  %s1731_s11 = sshll.u32 %s1946_s22, 12 }
  0x12   : > { %s255_s14 = scalar_lea.hbm %s2645_s0, %s1731_s11  ;;  %s247_s15 = scalar_lea.vmem [#allocation3], %s1688_s10 }
  0x13   : > { %s256_s16 = sshll.u32 %s247_s15, 4  ;;  %p2060_p0 = pnand %p1745_p13, %p2030_p4  ;;  %s257_s16 = int_to_ptr.vmem [resolvable:$true] %s256_s16 }
  0x14   : > { %p1691_p1 = scmp.ge.s32.totalorder %s1950_s23, 1  ;;  %s244_s24 = scalar_lea.sflag [#allocation4], %s243_s9 }
  0x15   : > { %p1844_p2 = pneg %p2060_p0  ;;  %s1855_s25 = scalar_lea.vmem %s257_s16, 4096 }
  0x16   : > { %p1856_p3 = scmp.ne.s32.totalorder %s257_s16, %s1855_s25  ;;  %s1952_s27 = smov [#allocation3]  }
  0x17   : > { %s1860_s29 = sshll.u32 %s1952_s27, 4  ;;  %s1861_s29 = int_to_ptr.vmem [resolvable:$false] %s1860_s29 }
  0x18   : > { %p1858_p5 = pnand %p1856_p3, %p1844_p2  ;;  %s1862_s10 = scalar_lea.vmem %s1861_s29, 8192 }
  0x19   : > { %p1863_p7 = scmp.lt.s32.totalorder %s257_s16, %s1861_s29  ;;  %p1864_p10 = scmp.lt.s32.totalorder %s1862_s10, %s1855_s25 }
  0x1a   : > { %p1859_p6 = pneg %p1858_p5 }
  0x1b   : > { %p1865_p12 = por %p1864_p10, %p1863_p7 }
  0x1d   : > { %p1866_p4 = pnand %p1865_p12, %p1859_p6 }
  0x1f   : > { %1869 = shalt.err (!%p1866_p4)
}
  0x20   : > { %s1953_s28 = smov 256   ;;  %s1954_s9 = smov 16  }
  0x21   : > { %1740 = dma.hbm_to_vmem [thread:$0]  (!%p2060_p0), %s255_s14, 4096, %s257_s16, %s244_s24, %s1953_s28, %s1953_s28, %s1954_s9  }
  0x22   : > { %p264_p13 = scmp.lt.s32.totalorder %s1950_s23, 3 }
  0x24   : > { %p265_p2 = pnand %p1691_p1, %p264_p13 }
  0x26   : > { %268 = sbr.rel (%p265_p2) target bundleno = 710 (0x2c6), region = 40 }
  0x2b   : > { %s2073_s11 = sand.u32 1, %s1934_s19  }
  0x2c   : > { %s1692_s12 = sshll.u32 %s2073_s11, 8  ;;  %s271_s13 = scalar_lea.sflag [#allocation4], %s2073_s11 }
  0x2d   : > { %s2079_s15 = scalar_lea.vmem [#allocation3], %s1692_s12 }
  0x2e   : > { %1921 = dma.done.wait (%p2036_p8), %s271_s13, 4096  }
  0x2f   : > { %1923 = vsyncadd (%p2036_p8), %s271_s13, 4294963200  ;;  %v1955_v0 = vmov 0   ;;  %v402_v1 = vld [vmem:[%s2079_s15 + $0xe8] sm:$0xff]  ;;  %v404_v2 = vld [vmem:[%s2079_s15 + $0xf8] sm:$0xff]  ;;  %s2556_s25 = scalar_lea.vmem [#allocation6], %s1692_s12  ;;  %s1732_s12 = sshll.u32 %s1942_s21, 12 }
  0x30   : > { %773 = vmatprep.mubr.bf16.mxu0 %v1955_v0  ;;  %1800 = vset.pattern.permute.xlu0 %v1955_v0  ;;  %v401_v3 = vld [vmem:[%s2079_s15 + $0xe0] sm:$0xff]  ;;  %v420_v4 = vpack.c.bf16 %v404_v2, %v402_v1  ;;  %v403_v5 = vld [vmem:[%s2079_s15 + $0xf0] sm:$0xff]  ;;  %v398_v6 = vld [vmem:[%s2079_s15 + $0xc8] sm:$0xff]  ;;  %s2593_s10 = scalar_lea.hbm %s2650_s5, %s1732_s12  ;;  %s1531_s21 = scalar_lea.sflag [#allocation5], %s2073_s11 }
  0x31   : > { %1801 = vset.pattern.permute.xlu1 %v1955_v0  ;;  %v400_v7 = vld [vmem:[%s2079_s15 + $0xd8] sm:$0xff]  ;;  %v419_v8 = vpack.c.bf16 %v403_v5, %v401_v3  ;;  %v397_v10 = vld [vmem:[%s2079_s15 + $0xc0] sm:$0xff]  ;;  %v399_v11 = vld [vmem:[%s2079_s15 + $0xd0] sm:$0xff]  ;;  %s1956_s9 = smov [#allocation6]  }
  0x32   : > { %v418_v9 = vpack.c.bf16 %v400_v7, %v398_v6  ;;  %v394_v12 = vld [vmem:[%s2079_s15 + $0xa8] sm:$0xff]  ;;  %741 = vmatprep.subr.bf16.mxu0 %v420_v4  ;;  %v396_v13 = vld [vmem:[%s2079_s15 + $0xb8] sm:$0xff]  ;;  %v417_v14 = vpack.c.bf16 %v399_v11, %v397_v10  ;;  %v393_v16 = vld [vmem:[%s2079_s15 + $0xa0] sm:$0xff]  ;;  %s1874_s13 = sshll.u32 %s1956_s9, 4  ;;  %s1875_s13 = int_to_ptr.vmem [resolvable:$false] %s1874_s13 }
  0x33   : > { %742 = vmatpush1.bf16.msra.mxu0 %v419_v8  ;;  %v416_v15 = vpack.c.bf16 %v396_v13, %v394_v12  ;;  %v395_v17 = vld [vmem:[%s2079_s15 + $0xb0] sm:$0xff]  ;;  %v390_v18 = vld [vmem:[%s2079_s15 + $0x88] sm:$0xff]  ;;  %v392_v19 = vld [vmem:[%s2079_s15 + $0x98] sm:$0xff]  ;;  %s1876_s30 = scalar_lea.vmem %s1875_s13, 8192 }
  0x34   : > { %743 = vmatprep.subr.bf16.mxu0 %v418_v9  ;;  %v415_v20 = vpack.c.bf16 %v395_v17, %v393_v16  ;;  %v414_v21 = vpack.c.bf16 %v392_v19, %v390_v18  ;;  %v389_v22 = vld [vmem:[%s2079_s15 + $0x80] sm:$0xff]  ;;  %v391_v23 = vld [vmem:[%s2079_s15 + $0x90] sm:$0xff]  ;;  %v386_v24 = vld [vmem:[%s2079_s15 + $0x68] sm:$0xff] }
  0x35   : > { %v388_v25 = vld [vmem:[%s2079_s15 + $0x78] sm:$0xff]  ;;  %v385_v26 = vld [vmem:[%s2079_s15 + $0x60] sm:$0xff]  ;;  %v413_v27 = vpack.c.bf16 %v391_v23, %v389_v22  ;;  %v387_v28 = vld [vmem:[%s2079_s15 + $0x70] sm:$0xff] }
  0x36   : > { %v412_v29 = vpack.c.bf16 %v388_v25, %v386_v24  ;;  %v382_v30 = vld [vmem:[%s2079_s15 + $0x48] sm:$0xff]  ;;  %v384_v31 = vld [vmem:[%s2079_s15 + $0x58] sm:$0xff]  ;;  %v381_v32 = vld [vmem:[%s2079_s15 + $0x40] sm:$0xff]  ;;  %v411_v33 = vpack.c.bf16 %v387_v28, %v385_v26 }
  0x37   : > { %744 = vmatpush1.bf16.msra.mxu0 %v417_v14  ;;  %v383_v34 = vld [vmem:[%s2079_s15 + $0x50] sm:$0xff]  ;;  %v410_v36 = vpack.c.bf16 %v384_v31, %v382_v30  ;;  %v378_v37 = vld [vmem:[%s2079_s15 + $0x28] sm:$0xff]  ;;  %v465_v38 = vld [vmem:[%s2647_s2 + $0x60] sm:$0xff] }
  0x38   : > { %745 = vmatprep.subr.bf16.mxu0 %v416_v15  ;;  %v467_v35 = vld [vmem:[%s2647_s2 + $0x70] sm:$0xff]  ;;  %v380_v39 = vld [vmem:[%s2079_s15 + $0x38] sm:$0xff]  ;;  %547 = vperm.xlu1 %1801, %v465_v38   ;;  %v466_v41 = vld [vmem:[%s2647_s2 + $0x68] sm:$0xff]  ;;  %v409_v42 = vpack.c.bf16 %v383_v34, %v381_v32 }
  0x39   : > { %557 = vperm.xlu0 %1800, %v467_v35   ;;  %v468_v40 = vld [vmem:[%s2647_s2 + $0x78] sm:$0xff]  ;;  %v377_v43 = vld [vmem:[%s2079_s15 + $0x20] sm:$0xff]  ;;  %v408_v44 = vpack.c.bf16 %v380_v39, %v378_v37  ;;  %v379_v45 = vld [vmem:[%s2079_s15 + $0x30] sm:$0xff] }
  0x3a   : > { %v374_v46 = vld [vmem:[%s2079_s15 + $0x8] sm:$0xff]  ;;  %v376_v47 = vld [vmem:[%s2079_s15 + $0x18] sm:$0xff]  ;;  %v463_v48 = vld [vmem:[%s2647_s2 + $0x50] sm:$0xff]  ;;  %v407_v50 = vpack.c.bf16 %v379_v45, %v377_v43 }
  0x3b   : > { %746 = vmatpush1.bf16.msra.mxu0 %v415_v20  ;;  %v464_v49 = vld [vmem:[%s2647_s2 + $0x58] sm:$0xff]  ;;  %v406_v51 = vpack.c.bf16 %v376_v47, %v374_v46  ;;  %v373_v52 = vld [vmem:[%s2079_s15] sm:$0xff]  ;;  %v375_v53 = vld [vmem:[%s2079_s15 + $0x10] sm:$0xff]  ;;  %s1546_s15 = sshll.u32 %s2556_s25, 4  ;;  %s2595_s15 = int_to_ptr.vmem [resolvable:$true] %s1546_s15 }
  0x3c   : > { %747 = vmatprep.subr.bf16.mxu0 %v414_v21  ;;  %552 = vperm.xlu1 %1801, %v466_v41   ;;  %v461_v54 = vld [vmem:[%s2647_s2 + $0x40] sm:$0xff]  ;;  %v462_v55 = vld [vmem:[%s2647_s2 + $0x48] sm:$0xff]  ;;  %v405_v56 = vpack.c.bf16 %v375_v53, %v373_v52  ;;  %v459_v57 = vld [vmem:[%s2647_s2 + $0x30] sm:$0xff]  ;;  %s1870_s28 = scalar_lea.vmem %s2595_s15, 4096  ;;  %p1877_p1 = scmp.lt.s32.totalorder %s2595_s15, %s1875_s13 }
  0x3d   : > { %562 = vperm.xlu0 %1800, %v468_v40   ;;  %v1802_v58 = vld [vmem:[%s2646_s1] sm:$0xff]   ;;  %v460_v59 = vld [vmem:[%s2647_s2 + $0x38] sm:$0xff]  ;;  %v458_v61 = vld [vmem:[%s2647_s2 + $0x28] sm:$0xff]  ;;  %p1871_p8 = scmp.ne.s32.totalorder %s2595_s15, %s1870_s28  ;;  %p1878_p3 = scmp.lt.s32.totalorder %s1876_s30, %s1870_s28 }
  0x3e   : > { %v457_v60 = vld [vmem:[%s2647_s2 + $0x20] sm:$0xff]  ;;  %v455_v62 = vld [vmem:[%s2647_s2 + $0x10] sm:$0xff]  ;;  %v1803_v63 = vld [vmem:[%s2646_s1 + $0x8] sm:$0xff]  }
  0x3f   : > { %748 = vmatpush1.bf16.msra.mxu0 %v413_v27  ;;  %v456_v1 = vld [vmem:[%s2647_s2 + $0x18] sm:$0xff]  ;;  %v453_v2 = vld [vmem:[%s2647_s2] sm:$0xff]  ;;  %v454_v3 = vld [vmem:[%s2647_s2 + $0x8] sm:$0xff]  ;;  %p1872_p12 = pnand %p1871_p8, %p2040_p9  ;;  %p1879_p5 = por %p1878_p3, %p1877_p1 }
  0x40   : > { %749 = vmatprep.subr.bf16.mxu0 %v412_v29  ;;  %542 = vperm.xlu1 %1801, %v464_v49   ;;  %v483_v4 = vld [vmem:[%s2647_s2 + $0xf0] sm:$0xff]  ;;  %v484_v6 = vld [vmem:[%s2647_s2 + $0xf8] sm:$0xff]  ;;  %v481_v7 = vld [vmem:[%s2647_s2 + $0xe0] sm:$0xff] }
  0x41   : > { %537 = vperm.xlu0 %1800, %v463_v48   ;;  %v1804_v5 = vld [vmem:[%s2646_s1 + $0x10] sm:$0xff]   ;;  %v482_v8 = vld [vmem:[%s2647_s2 + $0xe8] sm:$0xff]  ;;  %v1805_v10 = vld [vmem:[%s2646_s1 + $0x18] sm:$0xff]   ;;  %p1873_p0 = pneg %p1872_p12 }
  0x42   : > { %v479_v9 = vld [vmem:[%s2647_s2 + $0xd0] sm:$0xff]  ;;  %v480_v11 = vld [vmem:[%s2647_s2 + $0xd8] sm:$0xff]  ;;  %v477_v12 = vld [vmem:[%s2647_s2 + $0xc0] sm:$0xff] }
  0x43   : > { %750 = vmatpush1.bf16.msra.mxu0 %v411_v33  ;;  %v478_v13 = vld [vmem:[%s2647_s2 + $0xc8] sm:$0xff]  ;;  %v475_v14 = vld [vmem:[%s2647_s2 + $0xb0] sm:$0xff]  ;;  %v1806_v15 = vld [vmem:[%s2646_s1 + $0x20] sm:$0xff]   ;;  %p1880_p6 = pnand %p1879_p5, %p1873_p0 }
  0x44   : > { %751 = vmatprep.subr.bf16.mxu0 %v410_v36  ;;  %532 = vperm.xlu1 %1801, %v462_v55   ;;  %v476_v16 = vld [vmem:[%s2647_s2 + $0xb8] sm:$0xff]  ;;  %v473_v17 = vld [vmem:[%s2647_s2 + $0xa0] sm:$0xff]  ;;  %v474_v18 = vld [vmem:[%s2647_s2 + $0xa8] sm:$0xff] }
  0x45   : > { %527 = vperm.xlu0 %1800, %v461_v54   ;;  %v471_v19 = vld [vmem:[%s2647_s2 + $0x90] sm:$0xff]  ;;  %v1807_v20 = vld [vmem:[%s2646_s1 + $0x28] sm:$0xff]   ;;  %v472_v21 = vld [vmem:[%s2647_s2 + $0x98] sm:$0xff] }
  0x46   : > { %v469_v22 = vld [vmem:[%s2647_s2 + $0x80] sm:$0xff]  ;;  %v470_v23 = vld [vmem:[%s2647_s2 + $0x88] sm:$0xff]  ;;  %v1808_v25 = vld [vmem:[%s2646_s1 + $0x30] sm:$0xff]  }
  0x47   : > { %752 = vmatpush1.bf16.msra.mxu0 %v409_v42  ;;  %v1370_v24 = vld [vmem:[%s2649_s4] sm:$0xff]  ;;  %v1371_v26 = vld [vmem:[%s2649_s4 + $0x8] sm:$0xff]  ;;  %v1372_v27 = vld [vmem:[%s2649_s4 + $0x10] sm:$0xff] }
  0x48   : > { %753 = vmatprep.subr.bf16.mxu0 %v408_v44  ;;  %522 = vperm.xlu1 %1801, %v460_v59   ;;  %v1373_v28 = vld [vmem:[%s2649_s4 + $0x18] sm:$0xff]  ;;  %v1374_v29 = vld [vmem:[%s2649_s4 + $0x20] sm:$0xff]  ;;  %v1375_v31 = vld [vmem:[%s2649_s4 + $0x28] sm:$0xff] }
  0x49   : > { %517 = vperm.xlu0 %1800, %v459_v57   ;;  %v1809_v30 = vld [vmem:[%s2646_s1 + $0x38] sm:$0xff]   ;;  %v1376_v32 = vld [vmem:[%s2649_s4 + $0x30] sm:$0xff]  ;;  %v1378_v34 = vld [vmem:[%s2649_s4 + $0x40] sm:$0xff] }
  0x4a   : > { %v1377_v33 = vld [vmem:[%s2649_s4 + $0x38] sm:$0xff]  ;;  %v1810_v35 = vld [vmem:[%s2646_s1 + $0x40] sm:$0xff]   ;;  %v1379_v36 = vld [vmem:[%s2649_s4 + $0x48] sm:$0xff] }
  0x4b   : > { %754 = vmatpush1.bf16.msra.mxu0 %v407_v50  ;;  %v1380_v37 = vld [vmem:[%s2649_s4 + $0x50] sm:$0xff]  ;;  %v1381_v38 = vld [vmem:[%s2649_s4 + $0x58] sm:$0xff]  ;;  %v1382_v39 = vld [vmem:[%s2649_s4 + $0x60] sm:$0xff] }
  0x4c   : > { %755 = vmatprep.subr.bf16.mxu0 %v406_v51  ;;  %512 = vperm.xlu1 %1801, %v458_v61   ;;  %v1811_v40 = vld [vmem:[%s2646_s1 + $0x48] sm:$0xff]   ;;  %v1384_v42 = vld [vmem:[%s2649_s4 + $0x70] sm:$0xff]  ;;  %v1385_v43 = vld [vmem:[%s2649_s4 + $0x78] sm:$0xff] }
  0x4d   : > { %507 = vperm.xlu0 %1800, %v457_v60   ;;  %v1383_v41 = vld [vmem:[%s2649_s4 + $0x68] sm:$0xff]  ;;  %v1812_v44 = vld [vmem:[%s2646_s1 + $0x50] sm:$0xff]   ;;  %v1813_v45 = vld [vmem:[%s2646_s1 + $0x58] sm:$0xff]  }
  0x4e   : > { %v1814_v46 = vld [vmem:[%s2646_s1 + $0x60] sm:$0xff]   ;;  %v1815_v47 = vld [vmem:[%s2646_s1 + $0x68] sm:$0xff]   ;;  %v1816_v48 = vld [vmem:[%s2646_s1 + $0x70] sm:$0xff]  }
  0x4f   : > { %756 = vmatpush1.bf16.msra.mxu0 %v405_v56  ;;  %v1817_v49 = vld [vmem:[%s2646_s1 + $0x78] sm:$0xff]  }
  0x50   : > { %502 = vperm.xlu1 %1801, %v456_v1  }
  0x51   : > { %497 = vperm.xlu0 %1800, %v455_v62  }
  0x52   : > { %774 = vmatmul.mubr.bf16.vlgmr.msra.gmra.mxu0 %v1802_v58 }
  0x53   : > { %783 = vmatprep.mubr.bf16.mxu0 %v1955_v0 }
  0x54   : > { %492 = vperm.xlu1 %1801, %v454_v3  }
  0x55   : > { %487 = vperm.xlu0 %1800, %v453_v2  }
  0x58   : > { %642 = vperm.xlu1 %1801, %v484_v6  }
  0x59   : > { %637 = vperm.xlu0 %1800, %v483_v4  }
  0x5a   : > { %784 = vmatmul.mubr.bf16.gmra.mxu0 %v1803_v63 }
  0x5b   : > { %793 = vmatprep.mubr.bf16.mxu0 %v1955_v0 }
  0x5c   : > { %632 = vperm.xlu1 %1801, %v482_v8  }
  0x5d   : > { %627 = vperm.xlu0 %1800, %v481_v7  }
  0x60   : > { %622 = vperm.xlu1 %1801, %v480_v11  }
  0x61   : > { %617 = vperm.xlu0 %1800, %v479_v9  }
  0x62   : > { %794 = vmatmul.mubr.bf16.gmra.mxu0 %v1804_v5 }
  0x63   : > { %803 = vmatprep.mubr.bf16.mxu0 %v1955_v0 }
  0x64   : > { %612 = vperm.xlu1 %1801, %v478_v13  }
  0x65   : > { %607 = vperm.xlu0 %1800, %v477_v12  }
  0x68   : > { %602 = vperm.xlu1 %1801, %v476_v16  }
  0x69   : > { %597 = vperm.xlu0 %1800, %v475_v14  }
  0x6a   : > { %804 = vmatmul.mubr.bf16.gmra.mxu0 %v1805_v10 }
  0x6b   : > { %813 = vmatprep.mubr.bf16.mxu0 %v1955_v0 }
  0x6c   : > { %592 = vperm.xlu1 %1801, %v474_v18  }
  0x6d   : > { %587 = vperm.xlu0 %1800, %v473_v17  }
  0x70   : > { %582 = vperm.xlu1 %1801, %v472_v21  }
  0x71   : > { %577 = vperm.xlu0 %1800, %v471_v19  }
  0x72   : > { %814 = vmatmul.mubr.bf16.gmra.mxu0 %v1806_v15 }
  0x73   : > { %823 = vmatprep.mubr.bf16.mxu0 %v1955_v0 }
  0x74   : > { %572 = vperm.xlu1 %1801, %v470_v23  }
  0x75   : > { %567 = vperm.xlu0 %1800, %v469_v22  }
  0x78   : > { %1393 = vperm.xlu1 %1801, %v1371_v26  }
  0x79   : > { %1388 = vperm.xlu0 %1800, %v1370_v24  }
  0x7a   : > { %824 = vmatmul.mubr.bf16.gmra.mxu0 %v1807_v20 }
  0x7b   : > { %833 = vmatprep.mubr.bf16.mxu0 %v1955_v0 }
  0x7c   : > { %1403 = vperm.xlu1 %1801, %v1373_v28  }
  0x7d   : > { %1398 = vperm.xlu0 %1800, %v1372_v27  }
  0x80   : > { %1413 = vperm.xlu1 %1801, %v1375_v31  }
  0x81   : > { %1408 = vperm.xlu0 %1800, %v1374_v29  }
  0x82   : > { %834 = vmatmul.mubr.bf16.gmra.mxu0 %v1808_v25 }
  0x83   : > { %843 = vmatprep.mubr.bf16.mxu0 %v1955_v0 }
  0x84   : > { %1423 = vperm.xlu1 %1801, %v1377_v33  }
  0x85   : > { %1418 = vperm.xlu0 %1800, %v1376_v32  }
  0x88   : > { %1433 = vperm.xlu1 %1801, %v1379_v36  }
  0x89   : > { %1428 = vperm.xlu0 %1800, %v1378_v34  }
  0x8a   : > { %844 = vmatmul.mubr.bf16.gmra.mxu0 %v1809_v30 }
  0x8b   : > { %853 = vmatprep.mubr.bf16.mxu0 %v1955_v0 }
  0x8c   : > { %1443 = vperm.xlu1 %1801, %v1381_v38  }
  0x8d   : > { %1438 = vperm.xlu0 %1800, %v1380_v37  }
  0x90   : > { %1453 = vperm.xlu1 %1801, %v1383_v41  }
  0x91   : > { %1448 = vperm.xlu0 %1800, %v1382_v39  }
  0x92   : > { %854 = vmatmul.mubr.bf16.gmra.mxu0 %v1810_v35 }
  0x93   : > { %863 = vmatprep.mubr.bf16.mxu0 %v1955_v0 }
  0x94   : > { %1463 = vperm.xlu1 %1801, %v1385_v43  }
  0x95   : > { %1458 = vperm.xlu0 %1800, %v1384_v42  }
  0x9a   : > { %864 = vmatmul.mubr.bf16.gmra.mxu0 %v1811_v40 }
  0x9b   : > { %873 = vmatprep.mubr.bf16.mxu0 %v1955_v0 }
  0xa2   : > { %874 = vmatmul.mubr.bf16.gmra.mxu0 %v1812_v44  ;;  %v1820_v44 = vld [vmem:[%s2648_s3 + $0x4] ss:$8 sps:$4 sm:$0xff]  }
  0xa3   : > { %883 = vmatprep.mubr.bf16.mxu0 %v1955_v0  ;;  %1190 = vmatprep.mubr.bf16.mxu1 %v1820_v44 }
  0xaa   : > { %884 = vmatmul.mubr.bf16.gmra.mxu0 %v1813_v45 }
  0xab   : > { %893 = vmatprep.mubr.bf16.mxu0 %v1955_v0 }
  0xb2   : > { %894 = vmatmul.mubr.bf16.gmra.mxu0 %v1814_v46 }
  0xb3   : > { %903 = vmatprep.mubr.bf16.mxu0 %v1955_v0  ;;  %v2329_v51 = vpop.permute.xlu1 %547 }
  0xb4   : > { %v2327_v50 = vpop.permute.xlu0 %557 }
  0xb7   : > { %v2333_v53 = vpop.permute.xlu1 %552 }
  0xb8   : > { %v2331_v52 = vpop.permute.xlu0 %562 }
  0xba   : > { %904 = vmatmul.mubr.bf16.gmra.mxu0 %v1815_v47 }
  0xbb   : > { %913 = vmatprep.mubr.bf16.mxu0 %v1955_v0  ;;  %v2337_v55 = vpop.permute.xlu1 %542 }
  0xbc   : > { %v2335_v54 = vpop.permute.xlu0 %537 }
  0xc0   : > { %v2339_v56 = vpop.permute.xlu0 %527 }
  0xc2   : > { %914 = vmatmul.mubr.bf16.gmra.mxu0 %v1816_v48 }
  0xc3   : > { %923 = vmatprep.mubr.bf16.mxu0 %v1955_v0  ;;  %v2341_v0 = vpop.permute.xlu1 %532 }
  0xc4   : > { %v2343_v57 = vpop.permute.xlu0 %517 }
  0xc7   : > { %v2345_v58 = vpop.permute.xlu1 %522 }
  0xc8   : > { %v2347_v59 = vpop.permute.xlu0 %507 }
  0xca   : > { %924 = vmatmul.mubr.bf16.gmra.mxu0 %v1817_v49 }
  0xcb   : > { %v2349_v60 = vpop.permute.xlu1 %512 }
  0xcc   : > { %v498_v61 = vpop.permute.xlu0 %497 }
  0xcf   : > { %v503_v62 = vpop.permute.xlu1 %502 }
  0xd0   : > { %v488_v63 = vpop.permute.xlu0 %487 }
  0xd3   : > { %v493_v3 = vpop.permute.xlu1 %492 }
  0xd4   : > { %v2369_v35 = vpop.permute.xlu0 %637 }
  0xd7   : > { %v2373_v37 = vpop.permute.xlu1 %642 }
  0xd8   : > { %v2379_v40 = vpop.permute.xlu0 %627 }
  0xdb   : > { %v2383_v42 = vpop.permute.xlu1 %632 }
  0xdc   : > { %v2390_v46 = vpop.permute.xlu0 %617 }
  0xdf   : > { %v2392_v48 = vpop.permute.xlu1 %622 }
 0x112   : > { %v775_v1 = vpop.f32.mrf.mxu0 }
 0x113   : > { %v776_v4 = vadd.f32 %v775_v1, %v488_v63  ;;  %v2396_v1 = vpop.permute.xlu1 %612 }
 0x114   : > { %v777_v2 = vpop.f32.mrf.mxu0 }
 0x115   : > { %v778_v6 = vadd.f32 %v777_v2, %v488_v63  ;;  %v934_v9 = vmax.f32 %v776_v4, 0.0 }
 0x116   : > { %v779_v5 = vpop.f32.mrf.mxu0 }
 0x117   : > { %v780_v7 = vadd.f32 %v779_v5, %v493_v3  ;;  %v935_v13 = vmax.f32 %v778_v6, 0.0  ;;  %v2400_v5 = vpop.permute.xlu1 %602 }
 0x118   : > { %v781_v8 = vpop.f32.mrf.mxu0  ;;  %2663 = vst [vmem:[#allocation11_spill] sm:$0xff] %v2400_v5 }
 0x119   : > { %v936_v10 = vmax.f32 %v780_v7, 0.0  ;;  %v782_v11 = vadd.f32 %v781_v8, %v493_v3 }
 0x11a   : > { %v785_v12 = vpop.f32.mrf.mxu0 }
 0x11b   : > { %v2351_v14 = vpack.c.bf16 %v936_v10, %v934_v9  ;;  %v937_v15 = vmax.f32 %v782_v11, 0.0  ;;  %v786_v18 = vadd.f32 %v785_v12, %v498_v61  ;;  %v2404_v10 = vpop.permute.xlu1 %592 }
 0x11c   : > { %v787_v16 = vpop.f32.mrf.mxu0  ;;  %2665 = vst [vmem:[#allocation13_spill] sm:$0xff] %v2404_v10 }
 0x11d   : > { %v2353_v17 = vpack.c.bf16 %v937_v15, %v935_v13  ;;  %v788_v20 = vadd.f32 %v787_v16, %v498_v61  ;;  %v938_v23 = vmax.f32 %v786_v18, 0.0  ;;  %v2394_v61 = vpop.permute.xlu0 %607 }
 0x11e   : > { %v789_v19 = vpop.f32.mrf.mxu0  ;;  %2661 = vst [vmem:[#allocation9_spill] sm:$0xff] %v2394_v61 }
 0x11f   : > { %v790_v21 = vadd.f32 %v789_v19, %v503_v62  ;;  %v939_v27 = vmax.f32 %v788_v20, 0.0 }
 0x120   : > { %v791_v22 = vpop.f32.mrf.mxu0 }
 0x121   : > { %v940_v24 = vmax.f32 %v790_v21, 0.0  ;;  %v792_v25 = vadd.f32 %v791_v22, %v503_v62  ;;  %v2398_v3 = vpop.permute.xlu0 %597  ;;  %v2412_v21 = vpop.permute.xlu1 %582 }
 0x122   : > { %v2355_v26 = vpop.f32.mrf.mxu0  ;;  %2662 = vst [vmem:[#allocation10_spill] sm:$0xff] %v2398_v3 }
 0x123   : > { %v2357_v28 = vpack.c.bf16 %v940_v24, %v938_v23  ;;  %v941_v29 = vmax.f32 %v792_v25, 0.0 }
 0x124   : > { %v2359_v30 = vpop.f32.mrf.mxu0 }
 0x125   : > { %v2361_v31 = vpack.c.bf16 %v941_v29, %v939_v27  ;;  %v2402_v8 = vpop.permute.xlu0 %587 }
 0x126   : > { %v2363_v32 = vpop.f32.mrf.mxu0  ;;  %2664 = vst [vmem:[#allocation12_spill] sm:$0xff] %v2402_v8 }
 0x128   : > { %v2365_v33 = vpop.f32.mrf.mxu0 }
 0x129   : > { %v2406_v13 = vpop.permute.xlu0 %577 }
 0x12a   : > { %v2367_v34 = vpop.f32.mrf.mxu0 }
 0x12c   : > { %v2371_v36 = vpop.f32.mrf.mxu0 }
 0x12e   : > { %v2375_v38 = vpop.f32.mrf.mxu0 }
 0x130   : > { %v2377_v39 = vpop.f32.mrf.mxu0 }
 0x132   : > { %v2381_v41 = vpop.f32.mrf.mxu0 }
 0x134   : > { %v817_v43 = vpop.f32.mrf.mxu0 }
 0x136   : > { %v2388_v45 = vpop.f32.mrf.mxu0 }
 0x138   : > { %v821_v47 = vpop.f32.mrf.mxu0 }
 0x13a   : > { %v825_v49 = vpop.f32.mrf.mxu0 }
 0x13c   : > { %v827_v62 = vpop.f32.mrf.mxu0 }
 0x13d   : > { %v828_v3 = vadd.f32 %v827_v62, %v2335_v54  ;;  %v818_v62 = vadd.f32 %v817_v43, %v2339_v56 }
 0x13e   : > { %v829_v63 = vpop.f32.mrf.mxu0 }
 0x140   : > { %v831_v2 = vpop.f32.mrf.mxu0 }
 0x141   : > { %v832_v44 = vadd.f32 %v831_v2, %v2337_v55 }
 0x142   : > { %v835_v4 = vpop.f32.mrf.mxu0 }
 0x144   : > { %v837_v6 = vpop.f32.mrf.mxu0 }
 0x145   : > { %v838_v23 = vadd.f32 %v837_v6, %v2329_v51 }
 0x146   : > { %v839_v7 = vpop.f32.mrf.mxu0 }
 0x147   : > { %v840_v25 = vadd.f32 %v839_v7, %v2333_v53  ;;  %v959_v5 = vmax.f32 %v838_v23, 0.0 }
 0x148   : > { %v841_v9 = vpop.f32.mrf.mxu0 }
 0x149   : > { %v842_v16 = vadd.f32 %v841_v9, %v2333_v53  ;;  %v830_v53 = vadd.f32 %v829_v63, %v2337_v55  ;;  %v960_v7 = vmax.f32 %v840_v25, 0.0  ;;  %v955_v55 = vmax.f32 %v828_v3, 0.0 }
 0x14a   : > { %v845_v11 = vpop.f32.mrf.mxu0 }
 0x14b   : > { %v846_v20 = vadd.f32 %v845_v11, %v2327_v50  ;;  %v961_v9 = vmax.f32 %v842_v16, 0.0 }
 0x14c   : > { %v847_v12 = vpop.f32.mrf.mxu0 }
 0x14d   : > { %v848_v18 = vadd.f32 %v847_v12, %v2327_v50  ;;  %v962_v10 = vmax.f32 %v846_v20, 0.0  ;;  %v568_v50 = vpop.permute.xlu0 %567 }
 0x14e   : > { %v849_v15 = vpop.f32.mrf.mxu0 }
 0x14f   : > { %v850_v19 = vadd.f32 %v849_v15, %v2331_v52  ;;  %v963_v8 = vmax.f32 %v848_v18, 0.0  ;;  %v836_v15 = vadd.f32 %v835_v4, %v2329_v51  ;;  %v957_v18 = vmax.f32 %v832_v44, 0.0 }
 0x150   : > { %v851_v22 = vpop.f32.mrf.mxu0  ;;  %v812_v4 = vadd.f32 %v2377_v39, %v2345_v58 }
 0x151   : > { %v852_v24 = vadd.f32 %v851_v22, %v2331_v52  ;;  %v964_v27 = vmax.f32 %v850_v19, 0.0  ;;  %v822_v52 = vadd.f32 %v821_v47, %v2341_v0  ;;  %v573_v19 = vpop.permute.xlu1 %572  ;;  %v1011_v22 = vpack.c.bf16 %v961_v9, %v959_v5 }
 0x152   : > { %v855_v29 = vpop.f32.mrf.mxu0  ;;  %v958_v20 = vmax.f32 %v836_v15, 0.0  ;;  %v820_v5 = vadd.f32 %v2388_v45, %v2341_v0  ;;  %v1009_v39 = vpack.c.bf16 %v957_v18, %v955_v55  ;;  %v951_v15 = vmax.f32 %v818_v62, 0.0 }
 0x153   : > { %v965_v12 = vmax.f32 %v852_v24, 0.0  ;;  %v856_v6 = vadd.f32 %v855_v29, %v568_v50  ;;  %v1012_v16 = vpack.c.bf16 %v964_v27, %v962_v10  ;;  %v953_v10 = vmax.f32 %v822_v52, 0.0 }
 0x154   : > { %v857_v11 = vpop.f32.mrf.mxu0  ;;  %v1010_v27 = vpack.c.bf16 %v960_v7, %v958_v20  ;;  %v949_v52 = vmax.f32 %v812_v4, 0.0  ;;  %v796_v20 = vadd.f32 %v2355_v26, %v2347_v59 }
 0x155   : > { %v1013_v61 = vpack.c.bf16 %v965_v12, %v963_v8  ;;  %v858_v24 = vadd.f32 %v857_v11, %v568_v50  ;;  %v826_v8 = vadd.f32 %v825_v49, %v2335_v54  ;;  %v966_v63 = vmax.f32 %v856_v6, 0.0 }
 0x156   : > { %v859_v2 = vpop.f32.mrf.mxu0  ;;  %v816_v49 = vadd.f32 %v2381_v41, %v2339_v56  ;;  %v808_v12 = vadd.f32 %v2371_v36, %v2343_v57  ;;  %v802_v50 = vadd.f32 %v2365_v33, %v2349_v60  ;;  %v810_v11 = vadd.f32 %v2375_v38, %v2345_v58 }
 0x157   : > { %v860_v51 = vadd.f32 %v859_v2, %v573_v19  ;;  %1158 = vmatprep.subr.bf16.mxu1 %v1013_v61  ;;  %v956_v61 = vmax.f32 %v830_v53, 0.0  ;;  %v967_v44 = vmax.f32 %v858_v24, 0.0  ;;  %v954_v3 = vmax.f32 %v826_v8, 0.0 }
 0x158   : > { %v861_v47 = vpop.f32.mrf.mxu0  ;;  %1159 = vmatpush1.bf16.msra.mxu1 %v1012_v16  ;;  %v952_v6 = vmax.f32 %v820_v5, 0.0  ;;  %v1007_v53 = vpack.c.bf16 %v953_v10, %v951_v15  ;;  %v806_v2 = vadd.f32 %v2367_v34, %v2343_v57  ;;  %v950_v16 = vmax.f32 %v816_v49, 0.0 }
 0x159   : > { %v968_v23 = vmax.f32 %v860_v51, 0.0  ;;  %v862_v25 = vadd.f32 %v861_v47, %v573_v19  ;;  %1160 = vmatprep.subr.bf16.mxu1 %v1011_v22  ;;  %v1008_v56 = vpack.c.bf16 %v956_v61, %v954_v3  ;;  %v798_v19 = vadd.f32 %v2359_v30, %v2347_v59 }
 0x15a   : > { %v865_v29 = vpop.f32.mrf.mxu0  ;;  %v947_v18 = vmax.f32 %v808_v12, 0.0  ;;  %v945_v24 = vmax.f32 %v802_v50, 0.0  ;;  %v948_v51 = vmax.f32 %v810_v11, 0.0  ;;  %v1006_v4 = vpack.c.bf16 %v952_v6, %v950_v16 }
 0x15b   : > { %v2428_v43 = vpack.c.bf16 %v968_v23, %v966_v63  ;;  %v969_v54 = vmax.f32 %v862_v25, 0.0  ;;  %v866_v45 = vadd.f32 %v865_v29, %v2406_v13  ;;  %v946_v47 = vmax.f32 %v806_v2, 0.0 }
 0x15c   : > { %v867_v9 = vpop.f32.mrf.mxu0  ;;  %1161 = vmatpush1.bf16.msra.mxu1 %v1010_v27  ;;  %v1005_v30 = vpack.c.bf16 %v949_v52, %v947_v18  ;;  %v942_v5 = vmax.f32 %v796_v20, 0.0 }
 0x15d   : > { %v2434_v0 = vpack.c.bf16 %v969_v54, %v967_v44  ;;  %1162 = vmatprep.subr.bf16.mxu1 %v1009_v39  ;;  %v868_v7 = vadd.f32 %v867_v9, %v2406_v13  ;;  %v970_v58 = vmax.f32 %v866_v45, 0.0  ;;  %v800_v13 = vadd.f32 %v2363_v32, %v2349_v60 }
 0x15e   : > { %v869_v41 = vpop.f32.mrf.mxu0  ;;  %v1004_v32 = vpack.c.bf16 %v948_v51, %v946_v47  ;;  %v2666_v47 = vld [vmem:[#allocation9_spill] sm:$0xff] }
 0x15f   : > { %v870_v36 = vadd.f32 %v869_v41, %v2412_v21  ;;  %v971_v8 = vmax.f32 %v868_v7, 0.0  ;;  %v944_v60 = vmax.f32 %v800_v13, 0.0 }
 0x160   : > { %v871_v33 = vpop.f32.mrf.mxu0  ;;  %1163 = vmatpush1.bf16.msra.mxu1 %v1008_v56 }
 0x161   : > { %v972_v38 = vmax.f32 %v870_v36, 0.0  ;;  %v872_v22 = vadd.f32 %v871_v33, %v2412_v21  ;;  %1164 = vmatprep.subr.bf16.mxu1 %v1007_v53  ;;  %v943_v21 = vmax.f32 %v798_v19, 0.0  ;;  %v1002_v61 = vpack.c.bf16 %v944_v60, %v942_v5 }
 0x162   : > { %v2450_v62 = vpop.f32.mrf.mxu0 }
 0x163   : > { %v2452_v57 = vpack.c.bf16 %v972_v38, %v970_v58  ;;  %v973_v34 = vmax.f32 %v872_v22, 0.0  ;;  %v1003_v25 = vpack.c.bf16 %v945_v24, %v943_v21 }
 0x164   : > { %v2456_v55 = vpop.f32.mrf.mxu0  ;;  %1165 = vmatpush1.bf16.msra.mxu1 %v1006_v4 }
 0x165   : > { %v2458_v63 = vpack.c.bf16 %v973_v34, %v971_v8  ;;  %1166 = vmatprep.subr.bf16.mxu1 %v1005_v30 }
 0x166   : > { %v2460_v23 = vpop.f32.mrf.mxu0 }
 0x168   : > { %v2462_v10 = vpop.f32.mrf.mxu0  ;;  %1167 = vmatpush1.bf16.msra.mxu1 %v1004_v32 }
 0x169   : > { %1168 = vmatprep.subr.bf16.mxu1 %v1003_v25 }
 0x16a   : > { %v2464_v59 = vpop.f32.mrf.mxu0 }
 0x16c   : > { %v2466_v26 = vpop.f32.mrf.mxu0  ;;  %1169 = vmatpush1.bf16.msra.mxu1 %v1002_v61 }
 0x16d   : > { %1170 = vmatprep.subr.bf16.mxu1 %v2361_v31 }
 0x16e   : > { %v2469_v27 = vpop.f32.mrf.mxu0 }
 0x170   : > { %v891_v29 = vpop.f32.mrf.mxu0  ;;  %1171 = vmatpush1.bf16.msra.mxu1 %v2357_v28 }
 0x171   : > { %1172 = vmatprep.subr.bf16.mxu1 %v2353_v17 }
 0x172   : > { %v895_v39 = vpop.f32.mrf.mxu0 }
 0x174   : > { %v897_v44 = vpop.f32.mrf.mxu0  ;;  %1173 = vmatpush1.bf16.msra.mxu1 %v2351_v14 }
 0x176   : > { %v899_v54 = vpop.f32.mrf.mxu0 }
 0x177   : > { %v900_v60 = vadd.f32 %v899_v54, %v2396_v1  ;;  %v2669_v54 = vld [vmem:[#allocation13_spill] sm:$0xff] }
 0x178   : > { %v901_v49 = vpop.f32.mrf.mxu0 }
 0x17a   : > { %v905_v3 = vpop.f32.mrf.mxu0 }
 0x17b   : > { %v906_v34 = vadd.f32 %v905_v3, %v2390_v46 }
 0x17c   : > { %v907_v9 = vpop.f32.mrf.mxu0 }
 0x17d   : > { %v908_v13 = vadd.f32 %v907_v9, %v2390_v46 }
 0x17e   : > { %v909_v12 = vpop.f32.mrf.mxu0 }
 0x17f   : > { %v910_v51 = vadd.f32 %v909_v12, %v2392_v48  ;;  %v987_v21 = vmax.f32 %v908_v13, 0.0  ;;  %v986_v12 = vmax.f32 %v906_v34, 0.0  ;;  %v1839_v13 = vld [vmem:[%s2648_s3 + $0x74] ss:$8 sps:$4 sm:$0xff]  }
 0x180   : > { %v911_v15 = vpop.f32.mrf.mxu0 }
 0x181   : > { %v912_v16 = vadd.f32 %v911_v15, %v2392_v48  ;;  %v988_v32 = vmax.f32 %v910_v51, 0.0  ;;  %v2667_v48 = vld [vmem:[#allocation11_spill] sm:$0xff]  ;;  %v2668_v15 = vld [vmem:[#allocation10_spill] sm:$0xff] }
 0x182   : > { %v915_v45 = vpop.f32.mrf.mxu0  ;;  %v892_v5 = vadd.f32 %v891_v29, %v2667_v48  ;;  %v888_v46 = vadd.f32 %v2466_v26, %v2668_v15 }
 0x183   : > { %v916_v38 = vadd.f32 %v915_v45, %v2379_v40  ;;  %v984_v45 = vmax.f32 %v900_v60, 0.0 }
 0x184   : > { %v917_v50 = vpop.f32.mrf.mxu0  ;;  %v981_v29 = vmax.f32 %v892_v5, 0.0 }
 0x185   : > { %v918_v7 = vadd.f32 %v917_v50, %v2379_v40  ;;  %v990_v20 = vmax.f32 %v916_v38, 0.0  ;;  %v898_v40 = vadd.f32 %v897_v44, %v2666_v47  ;;  %v890_v44 = vadd.f32 %v2469_v27, %v2667_v48  ;;  %v1836_v38 = vld [vmem:[%s2648_s3 + $0x64] ss:$8 sps:$4 sm:$0xff]  }
 0x186   : > { %v919_v31 = vpop.f32.mrf.mxu0  ;;  %v882_v50 = vadd.f32 %v2462_v10, %v2669_v54  ;;  %v880_v27 = vadd.f32 %v2460_v23, %v2669_v54  ;;  %v1821_v23 = vld [vmem:[%s2648_s3 + $0x14] ss:$8 sps:$4 sm:$0xff]  }
 0x187   : > { %v920_v19 = vadd.f32 %v919_v31, %v2383_v42  ;;  %v991_v24 = vmax.f32 %v918_v7, 0.0  ;;  %v983_v3 = vmax.f32 %v898_v40, 0.0 }
 0x188   : > { %v921_v11 = vpop.f32.mrf.mxu0 }
 0x189   : > { %v922_v28 = vadd.f32 %v921_v11, %v2383_v42  ;;  %v992_v4 = vmax.f32 %v920_v19, 0.0  ;;  %v989_v42 = vmax.f32 %v912_v16, 0.0  ;;  %v1830_v16 = vld [vmem:[%s2648_s3 + $0x44] ss:$8 sps:$4 sm:$0xff]  }
 0x18a   : > { %v925_v6 = vpop.f32.mrf.mxu0 }
 0x18b   : > { %v926_v14 = vadd.f32 %v925_v6, %v2369_v35  ;;  %v993_v33 = vmax.f32 %v922_v28, 0.0  ;;  %v1026_v25 = vpack.c.bf16 %v992_v4, %v990_v20  ;;  %v1025_v9 = vpack.c.bf16 %v989_v42, %v987_v21  ;;  %v2670_v6 = vld [vmem:[#allocation12_spill] sm:$0xff]  ;;  %v1394_v42 = vpop.permute.xlu1 %1393 }
 0x18c   : > { %v927_v56 = vpop.f32.mrf.mxu0  ;;  %v878_v26 = vadd.f32 %v2456_v55, %v2670_v6  ;;  %v876_v10 = vadd.f32 %v2450_v62, %v2670_v6  ;;  %v1818_v62 = vld [vmem:[%s2648_s3] ss:$8 sps:$4 sm:$0xff]  }
 0x18d   : > { %v928_v17 = vadd.f32 %v927_v56, %v2369_v35  ;;  %v994_v22 = vmax.f32 %v926_v14, 0.0  ;;  %v1027_v8 = vpack.c.bf16 %v993_v33, %v991_v24  ;;  %v979_v56 = vmax.f32 %v888_v46, 0.0  ;;  %v1832_v33 = vld [vmem:[%s2648_s3 + $0x40] ss:$8 sps:$4 sm:$0xff]   ;;  %v1841_v24 = vld [vmem:[%s2648_s3 + $0x70] ss:$8 sps:$4 sm:$0xff]  }
 0x18e   : > { %v929_v41 = vpop.f32.mrf.mxu0  ;;  %v974_v55 = vmax.f32 %v876_v10, 0.0 }
 0x18f   : > { %v930_v52 = vadd.f32 %v929_v41, %v2373_v37  ;;  %v995_v18 = vmax.f32 %v928_v17, 0.0  ;;  %v980_v41 = vmax.f32 %v890_v44, 0.0  ;;  %v977_v17 = vmax.f32 %v882_v50, 0.0  ;;  %v1404_v48 = vpop.permute.xlu1 %1403 }
 0x190   : > { %v931_v53 = vpop.f32.mrf.mxu0 }
 0x191   : > { %v932_v36 = vadd.f32 %v931_v53, %v2373_v37  ;;  %v996_v2 = vmax.f32 %v930_v52, 0.0  ;;  %v902_v37 = vadd.f32 %v901_v49, %v2396_v1  ;;  %v896_v49 = vadd.f32 %v895_v39, %v2666_v47 }
 0x192   : > { %v1024_v1 = vpack.c.bf16 %v988_v32, %v986_v12  ;;  %v886_v39 = vadd.f32 %v2464_v59, %v2668_v15  ;;  %v1021_v52 = vpack.c.bf16 %v981_v29, %v979_v56  ;;  %v975_v59 = vmax.f32 %v878_v26, 0.0 }
 0x193   : > { %v997_v58 = vmax.f32 %v932_v36, 0.0  ;;  %v1028_v30 = vpack.c.bf16 %v996_v2, %v994_v22  ;;  %v985_v61 = vmax.f32 %v902_v37, 0.0  ;;  %v982_v11 = vmax.f32 %v896_v49, 0.0  ;;  %v1829_v2 = vld [vmem:[%s2648_s3 + $0x30] ss:$8 sps:$4 sm:$0xff]  }
 0x194   : > { %v978_v14 = vmax.f32 %v886_v39, 0.0  ;;  %v976_v53 = vmax.f32 %v880_v27, 0.0  ;;  %v1019_v36 = vpack.c.bf16 %v977_v17, %v975_v59  ;;  %v1838_v22 = vld [vmem:[%s2648_s3 + $0x60] ss:$8 sps:$4 sm:$0xff]  }
 0x195   : > { %v1029_v35 = vpack.c.bf16 %v997_v58, %v995_v18  ;;  %v1023_v31 = vpack.c.bf16 %v985_v61, %v983_v3  ;;  %v1022_v28 = vpack.c.bf16 %v984_v45, %v982_v11  ;;  %v1833_v18 = vld [vmem:[%s2648_s3 + $0x54] ss:$8 sps:$4 sm:$0xff]   ;;  %v1835_v58 = vld [vmem:[%s2648_s3 + $0x50] ss:$8 sps:$4 sm:$0xff]   ;;  %v1414_v45 = vpop.permute.xlu1 %1413 }
 0x196   : > { %v1020_v7 = vpack.c.bf16 %v980_v41, %v978_v14  ;;  %v1018_v19 = vpack.c.bf16 %v976_v53, %v974_v55 }
 0x197   : > { %1174 = vmatprep.subr.bf16.mxu1 %v1029_v35  ;;  %v1389_v35 = vpop.permute.xlu0 %1388 }
 0x198   : > { %1175 = vmatpush2.bf16.msra.mxu1 %v1028_v30 }
 0x199   : > { %1176 = vmatprep.subr.bf16.mxu1 %v1027_v8  ;;  %v1424_v56 = vpop.permute.xlu1 %1423 }
 0x19b   : > { %v1399_v40 = vpop.permute.xlu0 %1398 }
 0x19c   : > { %1177 = vmatpush2.bf16.msra.mxu1 %v1026_v25 }
 0x19d   : > { %1178 = vmatprep.subr.bf16.mxu1 %v1025_v9 }
 0x19f   : > { %v1409_v12 = vpop.permute.xlu0 %1408 }
 0x1a0   : > { %1179 = vmatpush2.bf16.msra.mxu1 %v1024_v1 }
 0x1a1   : > { %1180 = vmatprep.subr.bf16.mxu1 %v1023_v31 }
 0x1a3   : > { %v1419_v31 = vpop.permute.xlu0 %1418 }
 0x1a4   : > { %1181 = vmatpush2.bf16.msra.mxu1 %v1022_v28 }
 0x1a5   : > { %1182 = vmatprep.subr.bf16.mxu1 %v1021_v52 }
 0x1a7   : > { %v1429_v52 = vpop.permute.xlu0 %1428 }
 0x1a8   : > { %1183 = vmatpush2.bf16.msra.mxu1 %v1020_v7  ;;  %v1434_v7 = vpop.permute.xlu1 %1433 }
 0x1a9   : > { %1184 = vmatprep.subr.bf16.mxu1 %v1019_v36 }
 0x1ac   : > { %1185 = vmatpush2.bf16.msra.mxu1 %v1018_v19 }
 0x1ad   : > { %1186 = vmatprep.subr.bf16.mxu1 %v2458_v63  ;;  %v1823_v63 = vld [vmem:[%s2648_s3 + $0x10] ss:$8 sps:$4 sm:$0xff]  }
 0x1b0   : > { %1187 = vmatpush2.bf16.msra.mxu1 %v2452_v57  ;;  %v1827_v57 = vld [vmem:[%s2648_s3 + $0x34] ss:$8 sps:$4 sm:$0xff]  }
 0x1b1   : > { %1188 = vmatprep.subr.bf16.mxu1 %v2434_v0  ;;  %v1824_v0 = vld [vmem:[%s2648_s3 + $0x24] ss:$8 sps:$4 sm:$0xff]  }
 0x1b4   : > { %1189 = vmatpush2.bf16.msra.mxu1 %v2428_v43  ;;  %v1826_v43 = vld [vmem:[%s2648_s3 + $0x20] ss:$8 sps:$4 sm:$0xff]  }
 0x1b7   : > { %1191 = vmatmul.mubr.bf16.vlgmr.msra.gmra.mxu1 %v1818_v62 }
 0x1b8   : > { %1200 = vmatprep.mubr.bf16.mxu1 %v1821_v23  ;;  %v1439_v23 = vpop.permute.xlu0 %1438 }
 0x1bf   : > { %1201 = vmatmul.mubr.bf16.gmra.mxu1 %v1823_v63 }
 0x1c0   : > { %1210 = vmatprep.mubr.bf16.mxu1 %v1824_v0 }
 0x1c7   : > { %1211 = vmatmul.mubr.bf16.gmra.mxu1 %v1826_v43 }
 0x1c8   : > { %1220 = vmatprep.mubr.bf16.mxu1 %v1827_v57 }
 0x1cf   : > { %1221 = vmatmul.mubr.bf16.gmra.mxu1 %v1829_v2  ;;  %v1444_v2 = vpop.permute.xlu1 %1443 }
 0x1d0   : > { %1230 = vmatprep.mubr.bf16.mxu1 %v1830_v16 }
 0x1d7   : > { %1231 = vmatmul.mubr.bf16.gmra.mxu1 %v1832_v33 }
 0x1d8   : > { %1240 = vmatprep.mubr.bf16.mxu1 %v1833_v18 }
 0x1df   : > { %1241 = vmatmul.mubr.bf16.gmra.mxu1 %v1835_v58 }
 0x1e0   : > { %1250 = vmatprep.mubr.bf16.mxu1 %v1836_v38  ;;  %v1449_v38 = vpop.permute.xlu0 %1448 }
 0x1e7   : > { %1251 = vmatmul.mubr.bf16.gmra.mxu1 %v1838_v22 }
 0x1e8   : > { %1260 = vmatprep.mubr.bf16.mxu1 %v1839_v13 }
 0x1ef   : > { %1261 = vmatmul.mubr.bf16.gmra.mxu1 %v1841_v24 }
 0x277   : > { %v1192_v51 = vpop.f32.mrf.mxu1 }
 0x278   : > { %v1466_v4 = vadd.f32 %v1389_v35, %v1192_v51  ;;  %v1454_v51 = vpop.permute.xlu1 %1453 }
 0x279   : > { %v1194_v30 = vpop.f32.mrf.mxu1 }
 0x27a   : > { %1498 = vst [vmem:[%s2556_s25] sm:$0xff] %v1466_v4  ;;  %v1467_v37 = vadd.f32 %v1389_v35, %v1194_v30 }
 0x27b   : > { %v1196_v8 = vpop.f32.mrf.mxu1 }
 0x27c   : > { %1499 = vst [vmem:[%s2556_s25 + $0x8] sm:$0xff] %v1467_v37  ;;  %v1468_v34 = vadd.f32 %v1394_v42, %v1196_v8  ;;  %v1459_v8 = vpop.permute.xlu0 %1458 }
 0x27d   : > { %v1198_v20 = vpop.f32.mrf.mxu1 }
 0x27e   : > { %1500 = vst [vmem:[%s2556_s25 + $0x10] sm:$0xff] %v1468_v34  ;;  %v1469_v47 = vadd.f32 %v1394_v42, %v1198_v20 }
 0x27f   : > { %v1202_v21 = vpop.f32.mrf.mxu1 }
 0x280   : > { %1501 = vst [vmem:[%s2556_s25 + $0x18] sm:$0xff] %v1469_v47  ;;  %v1470_v60 = vadd.f32 %v1399_v40, %v1202_v21  ;;  %v1464_v21 = vpop.permute.xlu1 %1463 }
 0x281   : > { %v1204_v32 = vpop.f32.mrf.mxu1 }
 0x282   : > { %1502 = vst [vmem:[%s2556_s25 + $0x20] sm:$0xff] %v1470_v60  ;;  %v1471_v25 = vadd.f32 %v1399_v40, %v1204_v32 }
 0x283   : > { %v1206_v5 = vpop.f32.mrf.mxu1 }
 0x284   : > { %1503 = vst [vmem:[%s2556_s25 + $0x28] sm:$0xff] %v1471_v25  ;;  %v1472_v61 = vadd.f32 %v1404_v48, %v1206_v5 }
 0x285   : > { %v1208_v9 = vpop.f32.mrf.mxu1 }
 0x286   : > { %1504 = vst [vmem:[%s2556_s25 + $0x30] sm:$0xff] %v1472_v61  ;;  %v1473_v49 = vadd.f32 %v1404_v48, %v1208_v9 }
 0x287   : > { %v1212_v15 = vpop.f32.mrf.mxu1 }
 0x288   : > { %1505 = vst [vmem:[%s2556_s25 + $0x38] sm:$0xff] %v1473_v49  ;;  %v1474_v46 = vadd.f32 %v1409_v12, %v1212_v15 }
 0x289   : > { %v1214_v3 = vpop.f32.mrf.mxu1 }
 0x28a   : > { %1506 = vst [vmem:[%s2556_s25 + $0x40] sm:$0xff] %v1474_v46  ;;  %v1475_v44 = vadd.f32 %v1409_v12, %v1214_v3 }
 0x28b   : > { %v1216_v1 = vpop.f32.mrf.mxu1 }
 0x28c   : > { %1507 = vst [vmem:[%s2556_s25 + $0x48] sm:$0xff] %v1475_v44  ;;  %v1476_v54 = vadd.f32 %v1414_v45, %v1216_v1 }
 0x28d   : > { %v1218_v50 = vpop.f32.mrf.mxu1 }
 0x28e   : > { %1508 = vst [vmem:[%s2556_s25 + $0x50] sm:$0xff] %v1476_v54  ;;  %v1477_v29 = vadd.f32 %v1414_v45, %v1218_v50 }
 0x28f   : > { %v1222_v39 = vpop.f32.mrf.mxu1 }
 0x290   : > { %1509 = vst [vmem:[%s2556_s25 + $0x58] sm:$0xff] %v1477_v29  ;;  %v1478_v11 = vadd.f32 %v1419_v31, %v1222_v39 }
 0x291   : > { %v1224_v6 = vpop.f32.mrf.mxu1 }
 0x292   : > { %1510 = vst [vmem:[%s2556_s25 + $0x60] sm:$0xff] %v1478_v11  ;;  %v1479_v26 = vadd.f32 %v1419_v31, %v1224_v6 }
 0x293   : > { %v1226_v27 = vpop.f32.mrf.mxu1 }
 0x294   : > { %1511 = vst [vmem:[%s2556_s25 + $0x68] sm:$0xff] %v1479_v26  ;;  %v1480_v41 = vadd.f32 %v1424_v56, %v1226_v27 }
 0x295   : > { %v1228_v28 = vpop.f32.mrf.mxu1 }
 0x296   : > { %1512 = vst [vmem:[%s2556_s25 + $0x70] sm:$0xff] %v1480_v41  ;;  %v1481_v17 = vadd.f32 %v1424_v56, %v1228_v28 }
 0x297   : > { %v1232_v10 = vpop.f32.mrf.mxu1 }
 0x298   : > { %1513 = vst [vmem:[%s2556_s25 + $0x78] sm:$0xff] %v1481_v17  ;;  %v1482_v14 = vadd.f32 %v1429_v52, %v1232_v10 }
 0x299   : > { %v1234_v59 = vpop.f32.mrf.mxu1 }
 0x29a   : > { %1514 = vst [vmem:[%s2556_s25 + $0x80] sm:$0xff] %v1482_v14  ;;  %v1483_v53 = vadd.f32 %v1429_v52, %v1234_v59 }
 0x29b   : > { %v1236_v36 = vpop.f32.mrf.mxu1 }
 0x29c   : > { %1515 = vst [vmem:[%s2556_s25 + $0x88] sm:$0xff] %v1483_v53  ;;  %v1484_v55 = vadd.f32 %v1434_v7, %v1236_v36 }
 0x29d   : > { %v1238_v19 = vpop.f32.mrf.mxu1 }
 0x29e   : > { %1516 = vst [vmem:[%s2556_s25 + $0x90] sm:$0xff] %v1484_v55  ;;  %v1485_v62 = vadd.f32 %v1434_v7, %v1238_v19 }
 0x29f   : > { %v1242_v63 = vpop.f32.mrf.mxu1 }
 0x2a0   : > { %1517 = vst [vmem:[%s2556_s25 + $0x98] sm:$0xff] %v1485_v62  ;;  %v1486_v0 = vadd.f32 %v1439_v23, %v1242_v63 }
 0x2a1   : > { %v1244_v43 = vpop.f32.mrf.mxu1 }
 0x2a2   : > { %1518 = vst [vmem:[%s2556_s25 + $0xa0] sm:$0xff] %v1486_v0  ;;  %v1487_v57 = vadd.f32 %v1439_v23, %v1244_v43 }
 0x2a3   : > { %v1246_v16 = vpop.f32.mrf.mxu1 }
 0x2a4   : > { %1519 = vst [vmem:[%s2556_s25 + $0xa8] sm:$0xff] %v1487_v57  ;;  %v1488_v33 = vadd.f32 %v1444_v2, %v1246_v16 }
 0x2a5   : > { %v1248_v18 = vpop.f32.mrf.mxu1 }
 0x2a6   : > { %1520 = vst [vmem:[%s2556_s25 + $0xb0] sm:$0xff] %v1488_v33  ;;  %v1489_v58 = vadd.f32 %v1444_v2, %v1248_v18 }
 0x2a7   : > { %v1252_v22 = vpop.f32.mrf.mxu1 }
 0x2a8   : > { %1521 = vst [vmem:[%s2556_s25 + $0xb8] sm:$0xff] %v1489_v58  ;;  %v1490_v13 = vadd.f32 %v1449_v38, %v1252_v22 }
 0x2a9   : > { %v1254_v24 = vpop.f32.mrf.mxu1 }
 0x2aa   : > { %1522 = vst [vmem:[%s2556_s25 + $0xc0] sm:$0xff] %v1490_v13  ;;  %v1491_v35 = vadd.f32 %v1449_v38, %v1254_v24 }
 0x2ab   : > { %v1256_v4 = vpop.f32.mrf.mxu1 }
 0x2ac   : > { %1523 = vst [vmem:[%s2556_s25 + $0xc8] sm:$0xff] %v1491_v35  ;;  %v1492_v30 = vadd.f32 %v1454_v51, %v1256_v4 }
 0x2ad   : > { %v1258_v37 = vpop.f32.mrf.mxu1 }
 0x2ae   : > { %1524 = vst [vmem:[%s2556_s25 + $0xd0] sm:$0xff] %v1492_v30  ;;  %v1493_v42 = vadd.f32 %v1454_v51, %v1258_v37 }
 0x2af   : > { %v1262_v34 = vpop.f32.mrf.mxu1 }
 0x2b0   : > { %1525 = vst [vmem:[%s2556_s25 + $0xd8] sm:$0xff] %v1493_v42  ;;  %v1494_v20 = vadd.f32 %v1459_v8, %v1262_v34 }
 0x2b1   : > { %v1264_v47 = vpop.f32.mrf.mxu1 }
 0x2b2   : > { %1526 = vst [vmem:[%s2556_s25 + $0xe0] sm:$0xff] %v1494_v20  ;;  %v1495_v40 = vadd.f32 %v1459_v8, %v1264_v47 }
 0x2b3   : > { %v1266_v60 = vpop.f32.mrf.mxu1 }
 0x2b4   : > { %1527 = vst [vmem:[%s2556_s25 + $0xe8] sm:$0xff] %v1495_v40  ;;  %v1496_v32 = vadd.f32 %v1464_v21, %v1266_v60 }
 0x2b5   : > { %v1268_v25 = vpop.f32.mrf.mxu1 }
 0x2b6   : > { %1528 = vst [vmem:[%s2556_s25 + $0xf0] sm:$0xff] %v1496_v32  ;;  %v1497_v48 = vadd.f32 %v1464_v21, %v1268_v25 }
 0x2b8   : > { %1529 = vst [vmem:[%s2556_s25 + $0xf8] sm:$0xff] %v1497_v48 }
 0x2b9   : > { %1883 = shalt.err (!%p1880_p6)
}
 0x2ba   : > { %s1884_s14 = scalar_lea.hbm %s2593_s10, 4096  ;;  %s1888_s24 = scalar_lea.hbm %s2650_s5, 8192 }
 0x2bb   : > { %p1885_p7 = scmp.ne.s32.totalorder %s2593_s10, %s1884_s14  ;;  %p1889_p13 = scmp.lt.s32.totalorder %s2593_s10, %s2650_s5 }
 0x2bc   : > { %p1890_p2 = scmp.lt.s32.totalorder %s1888_s24, %s1884_s14 }
 0x2bd   : > { %p1886_p10 = pnand %p1885_p7, %p2040_p9 }
 0x2be   : > { %p1891_p8 = por %p1890_p2, %p1889_p13 }
 0x2bf   : > { %p1887_p4 = pneg %p1886_p10 }
 0x2c1   : > { %p1892_p12 = pnand %p1891_p8, %p1887_p4 }
 0x2c3   : > { %1895 = shalt.err (!%p1892_p12)
}
 0x2c4   : > { %s1957_s27 = smov 256   ;;  %s1958_s29 = smov 16  }
 0x2c5   : > { %1735 = dma.vmem_to_hbm [thread:$0]  (%p2040_p9), %s2595_s15, 4096, %s2593_s10, %s1531_s21, %s1957_s27, %s1957_s27, %s1958_s29  }
 0x2c6 PF: > { %s1561_s28 = sand.u32 1, %s1930_s18   ;;  %p2671_p0 = scmp.ge.s32.totalorder %s1950_s23, 2 }
 0x2c7   : > { %s1562_s9 = scalar_lea.sflag [#allocation5], %s1561_s28 }
 0x2c8   : > { %p1742_p1 = pnand %p2671_p0, %p2047_p11 }
 0x2ca   : > { %p1743_p3 = pneg %p1742_p1 }
 0x2cc   : > { %1925 = dma.done.wait (%p1743_p3), %s1562_s9, 4096  }
 0x2cd   : > { %1927 = vsyncadd (%p1743_p3), %s1562_s9, 4294963200  ;;  %s21_s23 = sadd.s32 1, %s1950_s23   ;;  %s2672_s18 = smov %s1934_s19 }
 0x2ce   : > { %p18_p5 = scmp.ge.s32.totalorder %s21_s23, 4   ;;  %s2673_s19 = smov %s1938_s20 }
 0x2cf   : > { %s2674_s20 = smov %s2045_s7  ;;  %s2675_s21 = smov %s1946_s22 }
 0x2d0   : > { %s2676_s22 = smov %s2678_s26  ;;  %20 = sbr.rel (!%p18_p5) target bundleno = 6 (0x6), region = 102 }
 0x2d5   :  { %1567 = vsyncpa [#allocation4], 1 }
 0x2d6   :  { %1569 = vsyncpa [#allocation4 + $0x1], 1 }
 0x2d7   :  { %1570 = vsyncpa [#allocation5], 1 }
 0x2d8   :  { %1572 = vsyncpa [#allocation5 + $0x1], 1 }

</bundles_post_ra>
